<compile_context>
chip_gen: v5e
topology: v5e:2x2
jax: 0.10.0
libtpu: 0.0.40
codegen_flags: <defaults>
</compile_context>

<pallas_src>
import jax
import jax.numpy as jnp
from jax import lax
from jax.experimental import pallas as pl
from jax.experimental.pallas import tpu as pltpu


def _round_up(n: int, m: int) -> int:
    return ((n + m - 1) // m) * m


# ----------------------------------------------------------------------------
# Pallas kernel: sequential LSTM recurrence over one (batch-tile, time-chunk)
# ----------------------------------------------------------------------------
def _lstm_recurrence_kernel(xg_ref, whh_ref, r_ref, h_ref, c_ref):
    """One grid step == `Tc` LSTM time steps for one batch tile.

    xg_ref : (Tc, Bt, 4Hp)  precomputed  x_t @ W_ih^T + (b_ih + b_hh), f32
    whh_ref: (Hp, 4Hp)      W_hh^T (per-gate padded), f32 or bf16 (resident)
    r_ref  : (Tc, Bt, Hp)   hidden states (LSTM output) for this chunk, f32
    h_ref  : (Bt, Hp)       f32 scratch, persists across time chunks
    c_ref  : (Bt, Hp)       f32 scratch, persists across time chunks
    Gate order follows PyTorch nn.LSTM: i, f, g, o.
    """
    # Re-initialize the recurrent state at the start of each batch tile.
    @pl.when(pl.program_id(1) == 0)
    def _():
        h_ref[...] = jnp.zeros_like(h_ref)
        c_ref[...] = jnp.zeros_like(c_ref)

    w_hh = whh_ref[...]                 # stays resident in VMEM across steps
    hp = h_ref.shape[-1]                # padded hidden dim (multiple of 128)
    tc = xg_ref.shape[0]                # time-chunk length (static)

    def step(i, carry):
        h = h_ref[...]
        c = c_ref[...]
        # Only the recurrent matmul is on the serial path (MXU, f32 acc).
        gates = xg_ref[i] + jnp.dot(h.astype(w_hh.dtype), w_hh,
                                    preferred_element_type=jnp.float32)
        # Hp is a multiple of 128 -> each gate slice is lane-aligned.
        i_g = jax.nn.sigmoid(gates[:, 0 * hp:1 * hp])
        f_g = jax.nn.sigmoid(gates[:, 1 * hp:2 * hp])
        g_g = jnp.tanh(gates[:, 2 * hp:3 * hp])
        o_g = jax.nn.sigmoid(gates[:, 3 * hp:4 * hp])

        c_new = f_g * c + i_g * g_g
        h_new = o_g * jnp.tanh(c_new)

        h_ref[...] = h_new
        c_ref[...] = c_new
        r_ref[i] = h_new                # full (Bt, Hp) unmasked lane-dense store
        return carry

    # Partial unroll gives the LLO scheduler visibility without code bloat.
    unroll = tc if tc <= 8 else 8
    lax.fori_loop(0, tc, step, 0, unroll=unroll)


# ----------------------------------------------------------------------------
# Parameter handling
# ----------------------------------------------------------------------------
def init_params(key, input_dim, rnn_dim, output_dim):
    """Raw PyTorch-layout parameters, uniform(-1/sqrt(H), 1/sqrt(H)) init."""
    H, D, O = rnn_dim, input_dim, output_dim
    ks = jax.random.split(key, 6)
    bound = 1.0 / (float(H) ** 0.5)

    def u(k, shape):
        return jax.random.uniform(k, shape, jnp.float32, -bound, bound)

    return {
        "w_ih": u(ks[0], (4 * H, D)),   # nn.LSTM weight_ih_l0
        "w_hh": u(ks[1], (4 * H, H)),   # nn.LSTM weight_hh_l0
        "b_ih": u(ks[2], (4 * H,)),
        "b_hh": u(ks[3], (4 * H,)),
        "w_out": u(ks[4], (O, H)),      # nn.Linear weight
        "b_out": u(ks[5], (O,)),
    }


def _pad_gate_cols(w, H, Hp):
    """(..., 4H) -> (..., 4Hp): zero-pad each of the 4 gate blocks to Hp."""
    lead = w.shape[:-1]
    w4 = w.reshape(lead + (4, H))
    pad = [(0, 0)] * len(lead) + [(0, 0), (0, Hp - H)]
    return jnp.pad(w4, pad).reshape(lead + (4 * Hp,))


def pack_params(raw, weight_dtype=jnp.float32):
    """Transpose + pad parameters for the kernel.

    H is padded to a multiple of 128 so gate slices / stores are lane-aligned.
    Zero padding is exact: padded hidden units have zero gates/bias, so they
    stay at h=c=0 and never influence real units or the output Linear.
    `weight_dtype` (e.g. jnp.bfloat16) is applied to the VMEM-resident W_hh.
    """
    w_ih, w_hh = raw["w_ih"], raw["w_hh"]
    b_ih, b_hh = raw["b_ih"], raw["b_hh"]
    w_out, b_out = raw["w_out"], raw["b_out"]
    H = w_hh.shape[1]
    D = w_ih.shape[1]
    O = w_out.shape[0]
    Hp = _round_up(H, 128)

    w_ih_t = _pad_gate_cols(w_ih.T, H, Hp)                          # (D, 4Hp)
    b_gates = _pad_gate_cols((b_ih + b_hh)[None, :], H, Hp)         # (1, 4Hp)
    w_hh_t = _pad_gate_cols(w_hh.T, H, Hp)                          # (H, 4Hp)
    w_hh_t = jnp.pad(w_hh_t, ((0, Hp - H), (0, 0))).astype(weight_dtype)
    w_out_t = jnp.pad(w_out.T, ((0, Hp - H), (0, 0)))               # (Hp, O)
    return {
        "w_ih_t": w_ih_t,
        "b_gates": b_gates,
        "w_hh_t": w_hh_t,
        "w_out_t": w_out_t,
        "b_out": b_out[None, :],
        "input_dim": D,
        "hidden_dim": H,
        "output_dim": O,
    }


# ----------------------------------------------------------------------------
# Forward pass
# ----------------------------------------------------------------------------
def rnn_model_forward(x, packed, *, time_chunk=32):
    """Pallas implementation of RNNModel.forward (LSTM, no embeddings).

    x: (B, T, input_dim) float32 (batch_first, like the PyTorch module)
    returns: o (B, T, output_dim), r (B, T, rnn_dim)   [r == module's rnn_output]
    """
    B, T, D = x.shape
    H = packed["hidden_dim"]
    O = packed["output_dim"]
    Hp = packed["w_hh_t"].shape[0]
    w_dtype = packed["w_hh_t"].dtype

    # --- padding / tiling choices (static Python ints) ----------------------
    if B > 256:
        Btile = 256
        Bp = _round_up(B, Btile)
    else:
        Bp = _round_up(B, 8)          # sublane alignment
        Btile = Bp
    Tc = min(time_chunk, T)
    Tp = _round_up(T, Tc)
    n_btiles = Bp // Btile
    n_tchunks = Tp // Tc

    x_p = x
    if Bp != B or Tp != T:
        x_p = jnp.pad(x, ((0, Bp - B), (0, Tp - T), (0, 0)))

    # --- hoisted input projection: one MXU-dense matmul, time-major output --
    xg_tm = (jnp.einsum("btd,dg->tbg", x_p, packed["w_ih_t"])
             + packed["b_gates"])                      # (Tp, Bp, 4Hp) f32

    # --- VMEM budget (double-buffered blocks + resident weight + scratch) ---
    w_itemsize = jnp.dtype(w_dtype).itemsize
    vmem_need = (2 * Tc * Btile * 4 * Hp * 4       # xg blocks (f32)
                 + 2 * Hp * 4 * Hp * w_itemsize    # W_hh (double-buffered)
                 + 2 * Tc * Btile * Hp * 4         # r blocks (f32)
                 + 2 * Btile * Hp * 4)             # h, c scratch
    vmem_limit = int(min(64 * 2 ** 20, max(2 * vmem_need, 16 * 2 ** 20)))

    grid_spec = pltpu.PrefetchScalarGridSpec(
        num_scalar_prefetch=0,
        grid=(n_btiles, n_tchunks),
        in_specs=[
            pl.BlockSpec((Tc, Btile, 4 * Hp), lambda b, t: (t, b, 0)),
            pl.BlockSpec((Hp, 4 * Hp), lambda b, t: (0, 0)),
        ],
        out_specs=pl.BlockSpec((Tc, Btile, Hp), lambda b, t: (t, b, 0)),
        scratch_shapes=[
            pltpu.VMEM((Btile, Hp), jnp.float32),   # h
            pltpu.VMEM((Btile, Hp), jnp.float32),   # c
        ],
    )

    r_tm = pl.pallas_call(
        _lstm_recurrence_kernel,
        out_shape=jax.ShapeDtypeStruct((Tp, Bp, Hp), jnp.float32),
        grid_spec=grid_spec,
        compiler_params=pltpu.CompilerParams(
            dimension_semantics=("parallel", "arbitrary"),
            vmem_limit_bytes=vmem_limit,
        ),
    )(xg_tm, packed["w_hh_t"])

    # --- hoisted output Linear directly on the time-major result ------------
    o_full = (jnp.einsum("tbh,ho->bto", r_tm, packed["w_out_t"])
              + packed["b_out"])                             # (Bp, Tp, O)
    o = o_full[:B, :T, :]
    r = jnp.transpose(r_tm, (1, 0, 2))[:B, :T, :H]           # (B, T, H)
    return o, r


# ----------------------------------------------------------------------------
# Pure-JAX reference (matches PyTorch nn.LSTM + nn.Linear semantics)
# ----------------------------------------------------------------------------
def _reference_forward(x, raw):
    B, T, D = x.shape
    H = raw["w_hh"].shape[1]
    w_ih_t = raw["w_ih"].T
    w_hh_t = raw["w_hh"].T
    b = raw["b_ih"] + raw["b_hh"]

    def step(carry, x_t):
        h, c = carry
        gates = x_t @ w_ih_t + h @ w_hh_t + b
        i_g = jax.nn.sigmoid(gates[:, 0 * H:1 * H])
        f_g = jax.nn.sigmoid(gates[:, 1 * H:2 * H])
        g_g = jnp.tanh(gates[:, 2 * H:3 * H])
        o_g = jax.nn.sigmoid(gates[:, 3 * H:4 * H])
        c_new = f_g * c + i_g * g_g
        h_new = o_g * jnp.tanh(c_new)
        return (h_new, c_new), h_new

    h0 = jnp.zeros((B, H), jnp.float32)
    c0 = jnp.zeros((B, H), jnp.float32)
    _, hs = jax.lax.scan(step, (h0, c0), jnp.transpose(x, (1, 0, 2)))
    r = jnp.transpose(hs, (1, 0, 2))                        # (B, T, H)
    o = r @ raw["w_out"].T + raw["b_out"]                   # (B, T, O)
    return o, r


if __name__ == "__main__":
    # Small shapes consistent with RNNModel("LSTM", input_dim, rnn_dim, output_dim)
    B, T = 2, 8
    input_dim, rnn_dim, output_dim = 16, 32, 8

    key = jax.random.PRNGKey(0)
    k_x, k_p = jax.random.split(key)
    x = jax.random.normal(k_x, (B, T, input_dim), jnp.float32)
    raw = init_params(k_p, input_dim, rnn_dim, output_dim)

    # ---- f32 weights: strict check against the pure-JAX reference ----------
    packed_f32 = pack_params(raw, weight_dtype=jnp.float32)
    fwd_f32 = jax.jit(lambda xx: rnn_model_forward(xx, packed_f32))
    o, r = fwd_f32(x)
    jax.block_until_ready((o, r))
    o_ref, r_ref = _reference_forward(x, raw)
    assert o.shape == (B, T, output_dim) and r.shape == (B, T, rnn_dim)
    assert jnp.allclose(o, o_ref, atol=1e-4, rtol=1e-4), "output mismatch (f32)"
    assert jnp.allclose(r, r_ref, atol=1e-4, rtol=1e-4), "rnn output mismatch (f32)"

    # ---- bf16 resident W_hh (f32 accumulation): loose check -----------------
    packed_bf16 = pack_params(raw, weight_dtype=jnp.bfloat16)
    fwd_bf16 = jax.jit(lambda xx: rnn_model_forward(xx, packed_bf16))
    o16, r16 = fwd_bf16(x)
    jax.block_until_ready((o16, r16))
    raw_rounded = dict(raw, w_hh=raw["w_hh"].astype(jnp.bfloat16).astype(jnp.float32))
    o_ref16, r_ref16 = _reference_forward(x, raw_rounded)
    assert jnp.allclose(o16, o_ref16, atol=5e-2, rtol=5e-2), "output mismatch (bf16)"
    assert jnp.allclose(r16, r_ref16, atol=5e-2, rtol=5e-2), "rnn output mismatch (bf16)"

    print("KERNEL_OK")
</pallas_src>

<mosaic_0001>
module attributes {stable_mosaic.version = 11 : i64} {
  func.func @_lstm_recurrence_kernel(%arg0: i32, %arg1: i32, %arg2: memref<8x8x512xf32, #tpu.memory_space<vmem>>, %arg3: memref<128x512xf32, #tpu.memory_space<vmem>>, %arg4: memref<8x8x128xf32, #tpu.memory_space<vmem>>, %arg5: memref<8x128xf32, #tpu.memory_space<vmem>>, %arg6: memref<8x128xf32, #tpu.memory_space<vmem>>) attributes {dimension_semantics = [#tpu.dimension_semantics<parallel>, #tpu.dimension_semantics<arbitrary>], iteration_bounds = array<i64: 1, 1>, scalar_prefetch = 0 : i64, scratch_operands = 2 : i64, tpu.core_type = #tpu.core_type<tc>, window_params = [{transform_indices = @transform_0, window_bounds = array<i64: 8, 8, 512>}, {pipeline_mode = #tpu.pipeline_mode<synchronous>, transform_indices = @transform_1, window_bounds = array<i64: 128, 512>}, {transform_indices = @transform_2, window_bounds = array<i64: 8, 8, 128>}]} {
    %c0_i32 = arith.constant 0 : i32
    %0 = arith.cmpi eq, %arg1, %c0_i32 : i32
    %1 = arith.extui %0 : i1 to i32
    %c0_i32_0 = arith.constant 0 : i32
    %2 = arith.cmpi ne, %1, %c0_i32_0 : i32
    scf.if %2 {
      %cst_130 = arith.constant 0.000000e+00 : f32
      %308 = vector.broadcast %cst_130 : f32 to vector<8x128xf32>
      %c0_131 = arith.constant 0 : index
      %c0_132 = arith.constant 0 : index
      %309 = vector.load %arg5[%c0_131, %c0_132] : memref<8x128xf32, #tpu.memory_space<vmem>>, vector<8x128xf32>
      tpu.vector_store %arg5[%c0_131, %c0_132], %308 {strides = array<i32>} : memref<8x128xf32, #tpu.memory_space<vmem>>, vector<8x128xf32>,
      %cst_133 = arith.constant 0.000000e+00 : f32
      %310 = vector.broadcast %cst_133 : f32 to vector<8x128xf32>
      %c0_134 = arith.constant 0 : index
      %c0_135 = arith.constant 0 : index
      %311 = vector.load %arg6[%c0_134, %c0_135] : memref<8x128xf32, #tpu.memory_space<vmem>>, vector<8x128xf32>
      tpu.vector_store %arg6[%c0_134, %c0_135], %310 {strides = array<i32>} : memref<8x128xf32, #tpu.memory_space<vmem>>, vector<8x128xf32>,
    } else {
    }
    %c0 = arith.constant 0 : index
    %c0_1 = arith.constant 0 : index
    %3 = vector.load %arg3[%c0, %c0_1] : memref<128x512xf32, #tpu.memory_space<vmem>>, vector<128x512xf32>
    %c0_i32_2 = arith.constant 0 : i32
    %c0_3 = arith.constant 0 : index
    %c0_4 = arith.constant 0 : index
    %4 = vector.load %arg5[%c0_3, %c0_4] : memref<8x128xf32, #tpu.memory_space<vmem>>, vector<8x128xf32>
    %c0_5 = arith.constant 0 : index
    %c0_6 = arith.constant 0 : index
    %5 = vector.load %arg6[%c0_5, %c0_6] : memref<8x128xf32, #tpu.memory_space<vmem>>, vector<8x128xf32>
    %6 = arith.index_cast %c0_i32_2 : i32 to index
    %c0_7 = arith.constant 0 : index
    %c0_8 = arith.constant 0 : index
    %7 = vector.load %arg2[%6, %c0_7, %c0_8] : memref<8x8x512xf32, #tpu.memory_space<vmem>>, vector<1x8x512xf32>
    %8 = vector.shape_cast %7 : vector<1x8x512xf32> to vector<8x512xf32>
    %cst = arith.constant dense<0.000000e+00> : vector<8x512xf32>
    %9 = tpu.matmul %4, %3, %cst {dimension_numbers = #tpu.dot_dimension_numbers<[1], [0], [0], [1], [0, 0, 1, 1], [], []>} : vector<8x128xf32>, vector<128x512xf32>, vector<8x512xf32> -> vector<8x512xf32>
    %10 = arith.addf %8, %9 : vector<8x512xf32>
    %11 = vector.extract_strided_slice %10 {offsets = [0, 0], sizes = [8, 128], strides = [1, 1]} : vector<8x512xf32> to vector<8x128xf32>
    %12 = arith.negf %11 : vector<8x128xf32>
    %13 = math.exp %12 : vector<8x128xf32>
    %cst_9 = arith.constant 1.000000e+00 : f32
    %14 = vector.broadcast %cst_9 : f32 to vector<8x128xf32>
    %15 = arith.addf %14, %13 : vector<8x128xf32>
    %16 = arith.divf %14, %15 : vector<8x128xf32>
    %17 = vector.extract_strided_slice %10 {offsets = [0, 128], sizes = [8, 128], strides = [1, 1]} : vector<8x512xf32> to vector<8x128xf32>
    %18 = arith.negf %17 : vector<8x128xf32>
    %19 = math.exp %18 : vector<8x128xf32>
    %cst_10 = arith.constant 1.000000e+00 : f32
    %20 = vector.broadcast %cst_10 : f32 to vector<8x128xf32>
    %21 = arith.addf %20, %19 : vector<8x128xf32>
    %22 = arith.divf %20, %21 : vector<8x128xf32>
    %23 = vector.extract_strided_slice %10 {offsets = [0, 256], sizes = [8, 128], strides = [1, 1]} : vector<8x512xf32> to vector<8x128xf32>
    %24 = math.tanh %23 : vector<8x128xf32>
    %25 = vector.extract_strided_slice %10 {offsets = [0, 384], sizes = [8, 128], strides = [1, 1]} : vector<8x512xf32> to vector<8x128xf32>
    %26 = arith.negf %25 : vector<8x128xf32>
    %27 = math.exp %26 : vector<8x128xf32>
    %cst_11 = arith.constant 1.000000e+00 : f32
    %28 = vector.broadcast %cst_11 : f32 to vector<8x128xf32>
    %29 = arith.addf %28, %27 : vector<8x128xf32>
    %30 = arith.divf %28, %29 : vector<8x128xf32>
    %31 = arith.mulf %22, %5 : vector<8x128xf32>
    %32 = arith.mulf %16, %24 : vector<8x128xf32>
    %33 = arith.addf %31, %32 : vector<8x128xf32>
    %34 = math.tanh %33 : vector<8x128xf32>
    %35 = arith.mulf %30, %34 : vector<8x128xf32>
    %c0_12 = arith.constant 0 : index
    %c0_13 = arith.constant 0 : index
    %36 = vector.load %arg5[%c0_12, %c0_13] : memref<8x128xf32, #tpu.memory_space<vmem>>, vector<8x128xf32>
    tpu.vector_store %arg5[%c0_12, %c0_13], %35 {strides = array<i32>} : memref<8x128xf32, #tpu.memory_space<vmem>>, vector<8x128xf32>,
    %c0_14 = arith.constant 0 : index
    %c0_15 = arith.constant 0 : index
    %37 = vector.load %arg6[%c0_14, %c0_15] : memref<8x128xf32, #tpu.memory_space<vmem>>, vector<8x128xf32>
    tpu.vector_store %arg6[%c0_14, %c0_15], %33 {strides = array<i32>} : memref<8x128xf32, #tpu.memory_space<vmem>>, vector<8x128xf32>,
    %38 = arith.index_cast %c0_i32_2 : i32 to index
    %c0_16 = arith.constant 0 : index
    %c0_17 = arith.constant 0 : index
    %39 = vector.load %arg4[%38, %c0_16, %c0_17] : memref<8x8x128xf32, #tpu.memory_space<vmem>>, vector<1x8x128xf32>
    %40 = vector.shape_cast %39 : vector<1x8x128xf32> to vector<8x128xf32>
    %41 = vector.shape_cast %35 : vector<8x128xf32> to vector<1x8x128xf32>
    tpu.vector_store %arg4[%38, %c0_16, %c0_17], %41 {strides = array<i32>} : memref<8x8x128xf32, #tpu.memory_space<vmem>>, vector<1x8x128xf32>,
    %c1_i32 = arith.constant 1 : i32
    %c0_18 = arith.constant 0 : index
    %c0_19 = arith.constant 0 : index
    %42 = vector.load %arg5[%c0_18, %c0_19] : memref<8x128xf32, #tpu.memory_space<vmem>>, vector<8x128xf32>
    %c0_20 = arith.constant 0 : index
    %c0_21 = arith.constant 0 : index
    %43 = vector.load %arg6[%c0_20, %c0_21] : memref<8x128xf32, #tpu.memory_space<vmem>>, vector<8x128xf32>
    %44 = arith.index_cast %c1_i32 : i32 to index
    %c0_22 = arith.constant 0 : index
    %c0_23 = arith.constant 0 : index
    %45 = vector.load %arg2[%44, %c0_22, %c0_23] : memref<8x8x512xf32, #tpu.memory_space<vmem>>, vector<1x8x512xf32>
    %46 = vector.shape_cast %45 : vector<1x8x512xf32> to vector<8x512xf32>
    %cst_24 = arith.constant dense<0.000000e+00> : vector<8x512xf32>
    %47 = tpu.matmul %42, %3, %cst_24 {dimension_numbers = #tpu.dot_dimension_numbers<[1], [0], [0], [1], [0, 0, 1, 1], [], []>} : vector<8x128xf32>, vector<128x512xf32>, vector<8x512xf32> -> vector<8x512xf32>
    %48 = arith.addf %46, %47 : vector<8x512xf32>
    %49 = vector.extract_strided_slice %48 {offsets = [0, 0], sizes = [8, 128], strides = [1, 1]} : vector<8x512xf32> to vector<8x128xf32>
    %50 = arith.negf %49 : vector<8x128xf32>
    %51 = math.exp %50 : vector<8x128xf32>
    %cst_25 = arith.constant 1.000000e+00 : f32
    %52 = vector.broadcast %cst_25 : f32 to vector<8x128xf32>
    %53 = arith.addf %52, %51 : vector<8x128xf32>
    %54 = arith.divf %52, %53 : vector<8x128xf32>
    %55 = vector.extract_strided_slice %48 {offsets = [0, 128], sizes = [8, 128], strides = [1, 1]} : vector<8x512xf32> to vector<8x128xf32>
    %56 = arith.negf %55 : vector<8x128xf32>
    %57 = math.exp %56 : vector<8x128xf32>
    %cst_26 = arith.constant 1.000000e+00 : f32
    %58 = vector.broadcast %cst_26 : f32 to vector<8x128xf32>
    %59 = arith.addf %58, %57 : vector<8x128xf32>
    %60 = arith.divf %58, %59 : vector<8x128xf32>
    %61 = vector.extract_strided_slice %48 {offsets = [0, 256], sizes = [8, 128], strides = [1, 1]} : vector<8x512xf32> to vector<8x128xf32>
    %62 = math.tanh %61 : vector<8x128xf32>
    %63 = vector.extract_strided_slice %48 {offsets = [0, 384], sizes = [8, 128], strides = [1, 1]} : vector<8x512xf32> to vector<8x128xf32>
    %64 = arith.negf %63 : vector<8x128xf32>
    %65 = math.exp %64 : vector<8x128xf32>
    %cst_27 = arith.constant 1.000000e+00 : f32
    %66 = vector.broadcast %cst_27 : f32 to vector<8x128xf32>
    %67 = arith.addf %66, %65 : vector<8x128xf32>
    %68 = arith.divf %66, %67 : vector<8x128xf32>
    %69 = arith.mulf %60, %43 : vector<8x128xf32>
    %70 = arith.mulf %54, %62 : vector<8x128xf32>
    %71 = arith.addf %69, %70 : vector<8x128xf32>
    %72 = math.tanh %71 : vector<8x128xf32>
    %73 = arith.mulf %68, %72 : vector<8x128xf32>
    %c0_28 = arith.constant 0 : index
    %c0_29 = arith.constant 0 : index
    %74 = vector.load %arg5[%c0_28, %c0_29] : memref<8x128xf32, #tpu.memory_space<vmem>>, vector<8x128xf32>
    tpu.vector_store %arg5[%c0_28, %c0_29], %73 {strides = array<i32>} : memref<8x128xf32, #tpu.memory_space<vmem>>, vector<8x128xf32>,
    %c0_30 = arith.constant 0 : index
    %c0_31 = arith.constant 0 : index
    %75 = vector.load %arg6[%c0_30, %c0_31] : memref<8x128xf32, #tpu.memory_space<vmem>>, vector<8x128xf32>
    tpu.vector_store %arg6[%c0_30, %c0_31], %71 {strides = array<i32>} : memref<8x128xf32, #tpu.memory_space<vmem>>, vector<8x128xf32>,
    %76 = arith.index_cast %c1_i32 : i32 to index
    %c0_32 = arith.constant 0 : index
    %c0_33 = arith.constant 0 : index
    %77 = vector.load %arg4[%76, %c0_32, %c0_33] : memref<8x8x128xf32, #tpu.memory_space<vmem>>, vector<1x8x128xf32>
    %78 = vector.shape_cast %77 : vector<1x8x128xf32> to vector<8x128xf32>
    %79 = vector.shape_cast %73 : vector<8x128xf32> to vector<1x8x128xf32>
    tpu.vector_store %arg4[%76, %c0_32, %c0_33], %79 {strides = array<i32>} : memref<8x8x128xf32, #tpu.memory_space<vmem>>, vector<1x8x128xf32>,
    %c2_i32 = arith.constant 2 : i32
    %c0_34 = arith.constant 0 : index
    %c0_35 = arith.constant 0 : index
    %80 = vector.load %arg5[%c0_34, %c0_35] : memref<8x128xf32, #tpu.memory_space<vmem>>, vector<8x128xf32>
    %c0_36 = arith.constant 0 : index
    %c0_37 = arith.constant 0 : index
    %81 = vector.load %arg6[%c0_36, %c0_37] : memref<8x128xf32, #tpu.memory_space<vmem>>, vector<8x128xf32>
    %82 = arith.index_cast %c2_i32 : i32 to index
    %c0_38 = arith.constant 0 : index
    %c0_39 = arith.constant 0 : index
    %83 = vector.load %arg2[%82, %c0_38, %c0_39] : memref<8x8x512xf32, #tpu.memory_space<vmem>>, vector<1x8x512xf32>
    %84 = vector.shape_cast %83 : vector<1x8x512xf32> to vector<8x512xf32>
    %cst_40 = arith.constant dense<0.000000e+00> : vector<8x512xf32>
    %85 = tpu.matmul %80, %3, %cst_40 {dimension_numbers = #tpu.dot_dimension_numbers<[1], [0], [0], [1], [0, 0, 1, 1], [], []>} : vector<8x128xf32>, vector<128x512xf32>, vector<8x512xf32> -> vector<8x512xf32>
    %86 = arith.addf %84, %85 : vector<8x512xf32>
    %87 = vector.extract_strided_slice %86 {offsets = [0, 0], sizes = [8, 128], strides = [1, 1]} : vector<8x512xf32> to vector<8x128xf32>
    %88 = arith.negf %87 : vector<8x128xf32>
    %89 = math.exp %88 : vector<8x128xf32>
    %cst_41 = arith.constant 1.000000e+00 : f32
    %90 = vector.broadcast %cst_41 : f32 to vector<8x128xf32>
    %91 = arith.addf %90, %89 : vector<8x128xf32>
    %92 = arith.divf %90, %91 : vector<8x128xf32>
    %93 = vector.extract_strided_slice %86 {offsets = [0, 128], sizes = [8, 128], strides = [1, 1]} : vector<8x512xf32> to vector<8x128xf32>
    %94 = arith.negf %93 : vector<8x128xf32>
    %95 = math.exp %94 : vector<8x128xf32>
    %cst_42 = arith.constant 1.000000e+00 : f32
    %96 = vector.broadcast %cst_42 : f32 to vector<8x128xf32>
    %97 = arith.addf %96, %95 : vector<8x128xf32>
    %98 = arith.divf %96, %97 : vector<8x128xf32>
    %99 = vector.extract_strided_slice %86 {offsets = [0, 256], sizes = [8, 128], strides = [1, 1]} : vector<8x512xf32> to vector<8x128xf32>
    %100 = math.tanh %99 : vector<8x128xf32>
    %101 = vector.extract_strided_slice %86 {offsets = [0, 384], sizes = [8, 128], strides = [1, 1]} : vector<8x512xf32> to vector<8x128xf32>
    %102 = arith.negf %101 : vector<8x128xf32>
    %103 = math.exp %102 : vector<8x128xf32>
    %cst_43 = arith.constant 1.000000e+00 : f32
    %104 = vector.broadcast %cst_43 : f32 to vector<8x128xf32>
    %105 = arith.addf %104, %103 : vector<8x128xf32>
    %106 = arith.divf %104, %105 : vector<8x128xf32>
    %107 = arith.mulf %98, %81 : vector<8x128xf32>
    %108 = arith.mulf %92, %100 : vector<8x128xf32>
    %109 = arith.addf %107, %108 : vector<8x128xf32>
    %110 = math.tanh %109 : vector<8x128xf32>
    %111 = arith.mulf %106, %110 : vector<8x128xf32>
    %c0_44 = arith.constant 0 : index
    %c0_45 = arith.constant 0 : index
    %112 = vector.load %arg5[%c0_44, %c0_45] : memref<8x128xf32, #tpu.memory_space<vmem>>, vector<8x128xf32>
    tpu.vector_store %arg5[%c0_44, %c0_45], %111 {strides = array<i32>} : memref<8x128xf32, #tpu.memory_space<vmem>>, vector<8x128xf32>,
    %c0_46 = arith.constant 0 : index
    %c0_47 = arith.constant 0 : index
    %113 = vector.load %arg6[%c0_46, %c0_47] : memref<8x128xf32, #tpu.memory_space<vmem>>, vector<8x128xf32>
    tpu.vector_store %arg6[%c0_46, %c0_47], %109 {strides = array<i32>} : memref<8x128xf32, #tpu.memory_space<vmem>>, vector<8x128xf32>,
    %114 = arith.index_cast %c2_i32 : i32 to index
    %c0_48 = arith.constant 0 : index
    %c0_49 = arith.constant 0 : index
    %115 = vector.load %arg4[%114, %c0_48, %c0_49] : memref<8x8x128xf32, #tpu.memory_space<vmem>>, vector<1x8x128xf32>
    %116 = vector.shape_cast %115 : vector<1x8x128xf32> to vector<8x128xf32>
    %117 = vector.shape_cast %111 : vector<8x128xf32> to vector<1x8x128xf32>
    tpu.vector_store %arg4[%114, %c0_48, %c0_49], %117 {strides = array<i32>} : memref<8x8x128xf32, #tpu.memory_space<vmem>>, vector<1x8x128xf32>,
    %c3_i32 = arith.constant 3 : i32
    %c0_50 = arith.constant 0 : index
    %c0_51 = arith.constant 0 : index
    %118 = vector.load %arg5[%c0_50, %c0_51] : memref<8x128xf32, #tpu.memory_space<vmem>>, vector<8x128xf32>
    %c0_52 = arith.constant 0 : index
    %c0_53 = arith.constant 0 : index
    %119 = vector.load %arg6[%c0_52, %c0_53] : memref<8x128xf32, #tpu.memory_space<vmem>>, vector<8x128xf32>
    %120 = arith.index_cast %c3_i32 : i32 to index
    %c0_54 = arith.constant 0 : index
    %c0_55 = arith.constant 0 : index
    %121 = vector.load %arg2[%120, %c0_54, %c0_55] : memref<8x8x512xf32, #tpu.memory_space<vmem>>, vector<1x8x512xf32>
    %122 = vector.shape_cast %121 : vector<1x8x512xf32> to vector<8x512xf32>
    %cst_56 = arith.constant dense<0.000000e+00> : vector<8x512xf32>
    %123 = tpu.matmul %118, %3, %cst_56 {dimension_numbers = #tpu.dot_dimension_numbers<[1], [0], [0], [1], [0, 0, 1, 1], [], []>} : vector<8x128xf32>, vector<128x512xf32>, vector<8x512xf32> -> vector<8x512xf32>
    %124 = arith.addf %122, %123 : vector<8x512xf32>
    %125 = vector.extract_strided_slice %124 {offsets = [0, 0], sizes = [8, 128], strides = [1, 1]} : vector<8x512xf32> to vector<8x128xf32>
    %126 = arith.negf %125 : vector<8x128xf32>
    %127 = math.exp %126 : vector<8x128xf32>
    %cst_57 = arith.constant 1.000000e+00 : f32
    %128 = vector.broadcast %cst_57 : f32 to vector<8x128xf32>
    %129 = arith.addf %128, %127 : vector<8x128xf32>
    %130 = arith.divf %128, %129 : vector<8x128xf32>
    %131 = vector.extract_strided_slice %124 {offsets = [0, 128], sizes = [8, 128], strides = [1, 1]} : vector<8x512xf32> to vector<8x128xf32>
    %132 = arith.negf %131 : vector<8x128xf32>
    %133 = math.exp %132 : vector<8x128xf32>
    %cst_58 = arith.constant 1.000000e+00 : f32
    %134 = vector.broadcast %cst_58 : f32 to vector<8x128xf32>
    %135 = arith.addf %134, %133 : vector<8x128xf32>
    %136 = arith.divf %134, %135 : vector<8x128xf32>
    %137 = vector.extract_strided_slice %124 {offsets = [0, 256], sizes = [8, 128], strides = [1, 1]} : vector<8x512xf32> to vector<8x128xf32>
    %138 = math.tanh %137 : vector<8x128xf32>
    %139 = vector.extract_strided_slice %124 {offsets = [0, 384], sizes = [8, 128], strides = [1, 1]} : vector<8x512xf32> to vector<8x128xf32>
    %140 = arith.negf %139 : vector<8x128xf32>
    %141 = math.exp %140 : vector<8x128xf32>
    %cst_59 = arith.constant 1.000000e+00 : f32
    %142 = vector.broadcast %cst_59 : f32 to vector<8x128xf32>
    %143 = arith.addf %142, %141 : vector<8x128xf32>
    %144 = arith.divf %142, %143 : vector<8x128xf32>
    %145 = arith.mulf %136, %119 : vector<8x128xf32>
    %146 = arith.mulf %130, %138 : vector<8x128xf32>
    %147 = arith.addf %145, %146 : vector<8x128xf32>
    %148 = math.tanh %147 : vector<8x128xf32>
    %149 = arith.mulf %144, %148 : vector<8x128xf32>
    %c0_60 = arith.constant 0 : index
    %c0_61 = arith.constant 0 : index
    %150 = vector.load %arg5[%c0_60, %c0_61] : memref<8x128xf32, #tpu.memory_space<vmem>>, vector<8x128xf32>
    tpu.vector_store %arg5[%c0_60, %c0_61], %149 {strides = array<i32>} : memref<8x128xf32, #tpu.memory_space<vmem>>, vector<8x128xf32>,
    %c0_62 = arith.constant 0 : index
    %c0_63 = arith.constant 0 : index
    %151 = vector.load %arg6[%c0_62, %c0_63] : memref<8x128xf32, #tpu.memory_space<vmem>>, vector<8x128xf32>
    tpu.vector_store %arg6[%c0_62, %c0_63], %147 {strides = array<i32>} : memref<8x128xf32, #tpu.memory_space<vmem>>, vector<8x128xf32>,
    %152 = arith.index_cast %c3_i32 : i32 to index
    %c0_64 = arith.constant 0 : index
    %c0_65 = arith.constant 0 : index
    %153 = vector.load %arg4[%152, %c0_64, %c0_65] : memref<8x8x128xf32, #tpu.memory_space<vmem>>, vector<1x8x128xf32>
    %154 = vector.shape_cast %153 : vector<1x8x128xf32> to vector<8x128xf32>
    %155 = vector.shape_cast %149 : vector<8x128xf32> to vector<1x8x128xf32>
    tpu.vector_store %arg4[%152, %c0_64, %c0_65], %155 {strides = array<i32>} : memref<8x8x128xf32, #tpu.memory_space<vmem>>, vector<1x8x128xf32>,
    %c4_i32 = arith.constant 4 : i32
    %c0_66 = arith.constant 0 : index
    %c0_67 = arith.constant 0 : index
    %156 = vector.load %arg5[%c0_66, %c0_67] : memref<8x128xf32, #tpu.memory_space<vmem>>, vector<8x128xf32>
    %c0_68 = arith.constant 0 : index
    %c0_69 = arith.constant 0 : index
    %157 = vector.load %arg6[%c0_68, %c0_69] : memref<8x128xf32, #tpu.memory_space<vmem>>, vector<8x128xf32>
    %158 = arith.index_cast %c4_i32 : i32 to index
    %c0_70 = arith.constant 0 : index
    %c0_71 = arith.constant 0 : index
    %159 = vector.load %arg2[%158, %c0_70, %c0_71] : memref<8x8x512xf32, #tpu.memory_space<vmem>>, vector<1x8x512xf32>
    %160 = vector.shape_cast %159 : vector<1x8x512xf32> to vector<8x512xf32>
    %cst_72 = arith.constant dense<0.000000e+00> : vector<8x512xf32>
    %161 = tpu.matmul %156, %3, %cst_72 {dimension_numbers = #tpu.dot_dimension_numbers<[1], [0], [0], [1], [0, 0, 1, 1], [], []>} : vector<8x128xf32>, vector<128x512xf32>, vector<8x512xf32> -> vector<8x512xf32>
    %162 = arith.addf %160, %161 : vector<8x512xf32>
    %163 = vector.extract_strided_slice %162 {offsets = [0, 0], sizes = [8, 128], strides = [1, 1]} : vector<8x512xf32> to vector<8x128xf32>
    %164 = arith.negf %163 : vector<8x128xf32>
    %165 = math.exp %164 : vector<8x128xf32>
    %cst_73 = arith.constant 1.000000e+00 : f32
    %166 = vector.broadcast %cst_73 : f32 to vector<8x128xf32>
    %167 = arith.addf %166, %165 : vector<8x128xf32>
    %168 = arith.divf %166, %167 : vector<8x128xf32>
    %169 = vector.extract_strided_slice %162 {offsets = [0, 128], sizes = [8, 128], strides = [1, 1]} : vector<8x512xf32> to vector<8x128xf32>
    %170 = arith.negf %169 : vector<8x128xf32>
    %171 = math.exp %170 : vector<8x128xf32>
    %cst_74 = arith.constant 1.000000e+00 : f32
    %172 = vector.broadcast %cst_74 : f32 to vector<8x128xf32>
    %173 = arith.addf %172, %171 : vector<8x128xf32>
    %174 = arith.divf %172, %173 : vector<8x128xf32>
    %175 = vector.extract_strided_slice %162 {offsets = [0, 256], sizes = [8, 128], strides = [1, 1]} : vector<8x512xf32> to vector<8x128xf32>
    %176 = math.tanh %175 : vector<8x128xf32>
    %177 = vector.extract_strided_slice %162 {offsets = [0, 384], sizes = [8, 128], strides = [1, 1]} : vector<8x512xf32> to vector<8x128xf32>
    %178 = arith.negf %177 : vector<8x128xf32>
    %179 = math.exp %178 : vector<8x128xf32>
    %cst_75 = arith.constant 1.000000e+00 : f32
    %180 = vector.broadcast %cst_75 : f32 to vector<8x128xf32>
    %181 = arith.addf %180, %179 : vector<8x128xf32>
    %182 = arith.divf %180, %181 : vector<8x128xf32>
    %183 = arith.mulf %174, %157 : vector<8x128xf32>
    %184 = arith.mulf %168, %176 : vector<8x128xf32>
    %185 = arith.addf %183, %184 : vector<8x128xf32>
    %186 = math.tanh %185 : vector<8x128xf32>
    %187 = arith.mulf %182, %186 : vector<8x128xf32>
    %c0_76 = arith.constant 0 : index
    %c0_77 = arith.constant 0 : index
    %188 = vector.load %arg5[%c0_76, %c0_77] : memref<8x128xf32, #tpu.memory_space<vmem>>, vector<8x128xf32>
    tpu.vector_store %arg5[%c0_76, %c0_77], %187 {strides = array<i32>} : memref<8x128xf32, #tpu.memory_space<vmem>>, vector<8x128xf32>,
    %c0_78 = arith.constant 0 : index
    %c0_79 = arith.constant 0 : index
    %189 = vector.load %arg6[%c0_78, %c0_79] : memref<8x128xf32, #tpu.memory_space<vmem>>, vector<8x128xf32>
    tpu.vector_store %arg6[%c0_78, %c0_79], %185 {strides = array<i32>} : memref<8x128xf32, #tpu.memory_space<vmem>>, vector<8x128xf32>,
    %190 = arith.index_cast %c4_i32 : i32 to index
    %c0_80 = arith.constant 0 : index
    %c0_81 = arith.constant 0 : index
    %191 = vector.load %arg4[%190, %c0_80, %c0_81] : memref<8x8x128xf32, #tpu.memory_space<vmem>>, vector<1x8x128xf32>
    %192 = vector.shape_cast %191 : vector<1x8x128xf32> to vector<8x128xf32>
    %193 = vector.shape_cast %187 : vector<8x128xf32> to vector<1x8x128xf32>
    tpu.vector_store %arg4[%190, %c0_80, %c0_81], %193 {strides = array<i32>} : memref<8x8x128xf32, #tpu.memory_space<vmem>>, vector<1x8x128xf32>,
    %c5_i32 = arith.constant 5 : i32
    %c0_82 = arith.constant 0 : index
    %c0_83 = arith.constant 0 : index
    %194 = vector.load %arg5[%c0_82, %c0_83] : memref<8x128xf32, #tpu.memory_space<vmem>>, vector<8x128xf32>
    %c0_84 = arith.constant 0 : index
    %c0_85 = arith.constant 0 : index
    %195 = vector.load %arg6[%c0_84, %c0_85] : memref<8x128xf32, #tpu.memory_space<vmem>>, vector<8x128xf32>
    %196 = arith.index_cast %c5_i32 : i32 to index
    %c0_86 = arith.constant 0 : index
    %c0_87 = arith.constant 0 : index
    %197 = vector.load %arg2[%196, %c0_86, %c0_87] : memref<8x8x512xf32, #tpu.memory_space<vmem>>, vector<1x8x512xf32>
    %198 = vector.shape_cast %197 : vector<1x8x512xf32> to vector<8x512xf32>
    %cst_88 = arith.constant dense<0.000000e+00> : vector<8x512xf32>
    %199 = tpu.matmul %194, %3, %cst_88 {dimension_numbers = #tpu.dot_dimension_numbers<[1], [0], [0], [1], [0, 0, 1, 1], [], []>} : vector<8x128xf32>, vector<128x512xf32>, vector<8x512xf32> -> vector<8x512xf32>
    %200 = arith.addf %198, %199 : vector<8x512xf32>
    %201 = vector.extract_strided_slice %200 {offsets = [0, 0], sizes = [8, 128], strides = [1, 1]} : vector<8x512xf32> to vector<8x128xf32>
    %202 = arith.negf %201 : vector<8x128xf32>
    %203 = math.exp %202 : vector<8x128xf32>
    %cst_89 = arith.constant 1.000000e+00 : f32
    %204 = vector.broadcast %cst_89 : f32 to vector<8x128xf32>
    %205 = arith.addf %204, %203 : vector<8x128xf32>
    %206 = arith.divf %204, %205 : vector<8x128xf32>
    %207 = vector.extract_strided_slice %200 {offsets = [0, 128], sizes = [8, 128], strides = [1, 1]} : vector<8x512xf32> to vector<8x128xf32>
    %208 = arith.negf %207 : vector<8x128xf32>
    %209 = math.exp %208 : vector<8x128xf32>
    %cst_90 = arith.constant 1.000000e+00 : f32
    %210 = vector.broadcast %cst_90 : f32 to vector<8x128xf32>
    %211 = arith.addf %210, %209 : vector<8x128xf32>
    %212 = arith.divf %210, %211 : vector<8x128xf32>
    %213 = vector.extract_strided_slice %200 {offsets = [0, 256], sizes = [8, 128], strides = [1, 1]} : vector<8x512xf32> to vector<8x128xf32>
    %214 = math.tanh %213 : vector<8x128xf32>
    %215 = vector.extract_strided_slice %200 {offsets = [0, 384], sizes = [8, 128], strides = [1, 1]} : vector<8x512xf32> to vector<8x128xf32>
    %216 = arith.negf %215 : vector<8x128xf32>
    %217 = math.exp %216 : vector<8x128xf32>
    %cst_91 = arith.constant 1.000000e+00 : f32
    %218 = vector.broadcast %cst_91 : f32 to vector<8x128xf32>
    %219 = arith.addf %218, %217 : vector<8x128xf32>
    %220 = arith.divf %218, %219 : vector<8x128xf32>
    %221 = arith.mulf %212, %195 : vector<8x128xf32>
    %222 = arith.mulf %206, %214 : vector<8x128xf32>
    %223 = arith.addf %221, %222 : vector<8x128xf32>
    %224 = math.tanh %223 : vector<8x128xf32>
    %225 = arith.mulf %220, %224 : vector<8x128xf32>
    %c0_92 = arith.constant 0 : index
    %c0_93 = arith.constant 0 : index
    %226 = vector.load %arg5[%c0_92, %c0_93] : memref<8x128xf32, #tpu.memory_space<vmem>>, vector<8x128xf32>
    tpu.vector_store %arg5[%c0_92, %c0_93], %225 {strides = array<i32>} : memref<8x128xf32, #tpu.memory_space<vmem>>, vector<8x128xf32>,
    %c0_94 = arith.constant 0 : index
    %c0_95 = arith.constant 0 : index
    %227 = vector.load %arg6[%c0_94, %c0_95] : memref<8x128xf32, #tpu.memory_space<vmem>>, vector<8x128xf32>
    tpu.vector_store %arg6[%c0_94, %c0_95], %223 {strides = array<i32>} : memref<8x128xf32, #tpu.memory_space<vmem>>, vector<8x128xf32>,
    %228 = arith.index_cast %c5_i32 : i32 to index
    %c0_96 = arith.constant 0 : index
    %c0_97 = arith.constant 0 : index
    %229 = vector.load %arg4[%228, %c0_96, %c0_97] : memref<8x8x128xf32, #tpu.memory_space<vmem>>, vector<1x8x128xf32>
    %230 = vector.shape_cast %229 : vector<1x8x128xf32> to vector<8x128xf32>
    %231 = vector.shape_cast %225 : vector<8x128xf32> to vector<1x8x128xf32>
    tpu.vector_store %arg4[%228, %c0_96, %c0_97], %231 {strides = array<i32>} : memref<8x8x128xf32, #tpu.memory_space<vmem>>, vector<1x8x128xf32>,
    %c6_i32 = arith.constant 6 : i32
    %c0_98 = arith.constant 0 : index
    %c0_99 = arith.constant 0 : index
    %232 = vector.load %arg5[%c0_98, %c0_99] : memref<8x128xf32, #tpu.memory_space<vmem>>, vector<8x128xf32>
    %c0_100 = arith.constant 0 : index
    %c0_101 = arith.constant 0 : index
    %233 = vector.load %arg6[%c0_100, %c0_101] : memref<8x128xf32, #tpu.memory_space<vmem>>, vector<8x128xf32>
    %234 = arith.index_cast %c6_i32 : i32 to index
    %c0_102 = arith.constant 0 : index
    %c0_103 = arith.constant 0 : index
    %235 = vector.load %arg2[%234, %c0_102, %c0_103] : memref<8x8x512xf32, #tpu.memory_space<vmem>>, vector<1x8x512xf32>
    %236 = vector.shape_cast %235 : vector<1x8x512xf32> to vector<8x512xf32>
    %cst_104 = arith.constant dense<0.000000e+00> : vector<8x512xf32>
    %237 = tpu.matmul %232, %3, %cst_104 {dimension_numbers = #tpu.dot_dimension_numbers<[1], [0], [0], [1], [0, 0, 1, 1], [], []>} : vector<8x128xf32>, vector<128x512xf32>, vector<8x512xf32> -> vector<8x512xf32>
    %238 = arith.addf %236, %237 : vector<8x512xf32>
    %239 = vector.extract_strided_slice %238 {offsets = [0, 0], sizes = [8, 128], strides = [1, 1]} : vector<8x512xf32> to vector<8x128xf32>
    %240 = arith.negf %239 : vector<8x128xf32>
    %241 = math.exp %240 : vector<8x128xf32>
    %cst_105 = arith.constant 1.000000e+00 : f32
    %242 = vector.broadcast %cst_105 : f32 to vector<8x128xf32>
    %243 = arith.addf %242, %241 : vector<8x128xf32>
    %244 = arith.divf %242, %243 : vector<8x128xf32>
    %245 = vector.extract_strided_slice %238 {offsets = [0, 128], sizes = [8, 128], strides = [1, 1]} : vector<8x512xf32> to vector<8x128xf32>
    %246 = arith.negf %245 : vector<8x128xf32>
    %247 = math.exp %246 : vector<8x128xf32>
    %cst_106 = arith.constant 1.000000e+00 : f32
    %248 = vector.broadcast %cst_106 : f32 to vector<8x128xf32>
    %249 = arith.addf %248, %247 : vector<8x128xf32>
    %250 = arith.divf %248, %249 : vector<8x128xf32>
    %251 = vector.extract_strided_slice %238 {offsets = [0, 256], sizes = [8, 128], strides = [1, 1]} : vector<8x512xf32> to vector<8x128xf32>
    %252 = math.tanh %251 : vector<8x128xf32>
    %253 = vector.extract_strided_slice %238 {offsets = [0, 384], sizes = [8, 128], strides = [1, 1]} : vector<8x512xf32> to vector<8x128xf32>
    %254 = arith.negf %253 : vector<8x128xf32>
    %255 = math.exp %254 : vector<8x128xf32>
    %cst_107 = arith.constant 1.000000e+00 : f32
    %256 = vector.broadcast %cst_107 : f32 to vector<8x128xf32>
    %257 = arith.addf %256, %255 : vector<8x128xf32>
    %258 = arith.divf %256, %257 : vector<8x128xf32>
    %259 = arith.mulf %250, %233 : vector<8x128xf32>
    %260 = arith.mulf %244, %252 : vector<8x128xf32>
    %261 = arith.addf %259, %260 : vector<8x128xf32>
    %262 = math.tanh %261 : vector<8x128xf32>
    %263 = arith.mulf %258, %262 : vector<8x128xf32>
    %c0_108 = arith.constant 0 : index
    %c0_109 = arith.constant 0 : index
    %264 = vector.load %arg5[%c0_108, %c0_109] : memref<8x128xf32, #tpu.memory_space<vmem>>, vector<8x128xf32>
    tpu.vector_store %arg5[%c0_108, %c0_109], %263 {strides = array<i32>} : memref<8x128xf32, #tpu.memory_space<vmem>>, vector<8x128xf32>,
    %c0_110 = arith.constant 0 : index
    %c0_111 = arith.constant 0 : index
    %265 = vector.load %arg6[%c0_110, %c0_111] : memref<8x128xf32, #tpu.memory_space<vmem>>, vector<8x128xf32>
    tpu.vector_store %arg6[%c0_110, %c0_111], %261 {strides = array<i32>} : memref<8x128xf32, #tpu.memory_space<vmem>>, vector<8x128xf32>,
    %266 = arith.index_cast %c6_i32 : i32 to index
    %c0_112 = arith.constant 0 : index
    %c0_113 = arith.constant 0 : index
    %267 = vector.load %arg4[%266, %c0_112, %c0_113] : memref<8x8x128xf32, #tpu.memory_space<vmem>>, vector<1x8x128xf32>
    %268 = vector.shape_cast %267 : vector<1x8x128xf32> to vector<8x128xf32>
    %269 = vector.shape_cast %263 : vector<8x128xf32> to vector<1x8x128xf32>
    tpu.vector_store %arg4[%266, %c0_112, %c0_113], %269 {strides = array<i32>} : memref<8x8x128xf32, #tpu.memory_space<vmem>>, vector<1x8x128xf32>,
    %c7_i32 = arith.constant 7 : i32
    %c0_114 = arith.constant 0 : index
    %c0_115 = arith.constant 0 : index
    %270 = vector.load %arg5[%c0_114, %c0_115] : memref<8x128xf32, #tpu.memory_space<vmem>>, vector<8x128xf32>
    %c0_116 = arith.constant 0 : index
    %c0_117 = arith.constant 0 : index
    %271 = vector.load %arg6[%c0_116, %c0_117] : memref<8x128xf32, #tpu.memory_space<vmem>>, vector<8x128xf32>
    %272 = arith.index_cast %c7_i32 : i32 to index
    %c0_118 = arith.constant 0 : index
    %c0_119 = arith.constant 0 : index
    %273 = vector.load %arg2[%272, %c0_118, %c0_119] : memref<8x8x512xf32, #tpu.memory_space<vmem>>, vector<1x8x512xf32>
    %274 = vector.shape_cast %273 : vector<1x8x512xf32> to vector<8x512xf32>
    %cst_120 = arith.constant dense<0.000000e+00> : vector<8x512xf32>
    %275 = tpu.matmul %270, %3, %cst_120 {dimension_numbers = #tpu.dot_dimension_numbers<[1], [0], [0], [1], [0, 0, 1, 1], [], []>} : vector<8x128xf32>, vector<128x512xf32>, vector<8x512xf32> -> vector<8x512xf32>
    %276 = arith.addf %274, %275 : vector<8x512xf32>
    %277 = vector.extract_strided_slice %276 {offsets = [0, 0], sizes = [8, 128], strides = [1, 1]} : vector<8x512xf32> to vector<8x128xf32>
    %278 = arith.negf %277 : vector<8x128xf32>
    %279 = math.exp %278 : vector<8x128xf32>
    %cst_121 = arith.constant 1.000000e+00 : f32
    %280 = vector.broadcast %cst_121 : f32 to vector<8x128xf32>
    %281 = arith.addf %280, %279 : vector<8x128xf32>
    %282 = arith.divf %280, %281 : vector<8x128xf32>
    %283 = vector.extract_strided_slice %276 {offsets = [0, 128], sizes = [8, 128], strides = [1, 1]} : vector<8x512xf32> to vector<8x128xf32>
    %284 = arith.negf %283 : vector<8x128xf32>
    %285 = math.exp %284 : vector<8x128xf32>
    %cst_122 = arith.constant 1.000000e+00 : f32
    %286 = vector.broadcast %cst_122 : f32 to vector<8x128xf32>
    %287 = arith.addf %286, %285 : vector<8x128xf32>
    %288 = arith.divf %286, %287 : vector<8x128xf32>
    %289 = vector.extract_strided_slice %276 {offsets = [0, 256], sizes = [8, 128], strides = [1, 1]} : vector<8x512xf32> to vector<8x128xf32>
    %290 = math.tanh %289 : vector<8x128xf32>
    %291 = vector.extract_strided_slice %276 {offsets = [0, 384], sizes = [8, 128], strides = [1, 1]} : vector<8x512xf32> to vector<8x128xf32>
    %292 = arith.negf %291 : vector<8x128xf32>
    %293 = math.exp %292 : vector<8x128xf32>
    %cst_123 = arith.constant 1.000000e+00 : f32
    %294 = vector.broadcast %cst_123 : f32 to vector<8x128xf32>
    %295 = arith.addf %294, %293 : vector<8x128xf32>
    %296 = arith.divf %294, %295 : vector<8x128xf32>
    %297 = arith.mulf %288, %271 : vector<8x128xf32>
    %298 = arith.mulf %282, %290 : vector<8x128xf32>
    %299 = arith.addf %297, %298 : vector<8x128xf32>
    %300 = math.tanh %299 : vector<8x128xf32>
    %301 = arith.mulf %296, %300 : vector<8x128xf32>
    %c0_124 = arith.constant 0 : index
    %c0_125 = arith.constant 0 : index
    %302 = vector.load %arg5[%c0_124, %c0_125] : memref<8x128xf32, #tpu.memory_space<vmem>>, vector<8x128xf32>
    tpu.vector_store %arg5[%c0_124, %c0_125], %301 {strides = array<i32>} : memref<8x128xf32, #tpu.memory_space<vmem>>, vector<8x128xf32>,
    %c0_126 = arith.constant 0 : index
    %c0_127 = arith.constant 0 : index
    %303 = vector.load %arg6[%c0_126, %c0_127] : memref<8x128xf32, #tpu.memory_space<vmem>>, vector<8x128xf32>
    tpu.vector_store %arg6[%c0_126, %c0_127], %299 {strides = array<i32>} : memref<8x128xf32, #tpu.memory_space<vmem>>, vector<8x128xf32>,
    %304 = arith.index_cast %c7_i32 : i32 to index
    %c0_128 = arith.constant 0 : index
    %c0_129 = arith.constant 0 : index
    %305 = vector.load %arg4[%304, %c0_128, %c0_129] : memref<8x8x128xf32, #tpu.memory_space<vmem>>, vector<1x8x128xf32>
    %306 = vector.shape_cast %305 : vector<1x8x128xf32> to vector<8x128xf32>
    %307 = vector.shape_cast %301 : vector<8x128xf32> to vector<1x8x128xf32>
    tpu.vector_store %arg4[%304, %c0_128, %c0_129], %307 {strides = array<i32>} : memref<8x8x128xf32, #tpu.memory_space<vmem>>, vector<1x8x128xf32>,
    %c8_i32 = arith.constant 8 : i32
    return
  }
  func.func @transform_0(%arg0: i32, %arg1: i32) -> (i32, i32, i32) {
    %c0_i32 = arith.constant 0 : i32
    %c0_i32_0 = arith.constant 0 : i32
    return %arg1, %arg0, %c0_i32 : i32, i32, i32
  }
  func.func @transform_1(%arg0: i32, %arg1: i32) -> (i32, i32) {
    %c0_i32 = arith.constant 0 : i32
    %c0_i32_0 = arith.constant 0 : i32
    %c0_i32_1 = arith.constant 0 : i32
    return %c0_i32, %c0_i32_0 : i32, i32
  }
  func.func @transform_2(%arg0: i32, %arg1: i32) -> (i32, i32, i32) {
    %c0_i32 = arith.constant 0 : i32
    %c0_i32_0 = arith.constant 0 : i32
    return %arg1, %arg0, %c0_i32 : i32, i32, i32
  }
}

</mosaic_0001>

<bundles_post_ra>
// kernel: _lambda_.1
= control target key start
LH: loop header
LB: loop body
LE: loop exit
PB: predicated region body
PF: predicated region fallthrough
CT: control target
= control target key end

     0   :  { %7 = vsyncpa [#allocation5], 0  ;;  %s1645_s12 = smov [#allocation4]   ;;  %s1646_s14 = smov 512   ;;  %s2583_s0 = inlined_call_operand.vmem [shape: f32[8,8,512], index: 0, kind: input, shape index: {}]   ;;  %s2584_s1 = inlined_call_operand.hbm [shape: f32[128,512], index: 1, kind: input, shape index: {}]   ;;  %s2585_s2 = inlined_call_operand.vmem [shape: f32[8,8,128], index: 2, kind: output, shape index: {}]  }
   0x1   :  { %s14_s11 = sshll.u32 %s2584_s1, 4  ;;  %s16_s13 = sshll.u32 %s1645_s12, 4  ;;  %s15_s11 = int_to_ptr.hbm [resolvable:$true] %s14_s11  ;;  %s17_s13 = int_to_ptr.vmem [resolvable:$true] %s16_s13 }
   0x2   :  { %s1647_s15 = smov 32  }
   0x3   :  { %22 = dma.hbm_to_vmem [thread:$0]  %s15_s11, 8192, %s17_s13, [#allocation5], %s1646_s14, %s1646_s14, %s1647_s15  }
   0x4   :  { %1643 = dma.done.wait [#allocation5], 8192  }
   0x5   :  { %1644 = vsyncadd [#allocation5], 4294959104  ;;  %v1667_v0 = vld [vmem:[#allocation4 + $0x1e0] sm:$0xff]  ;;  %v1669_v1 = vld [vmem:[#allocation4 + $0x1e8] sm:$0xff]  ;;  %v1648_v60 = vmov 0.0  }
   0x6   :  { %2692 = vst [vmem:[#allocation7_spill] sm:$0xff] %v1667_v0  ;;  %v1671_v2 = vld [vmem:[#allocation4 + $0x1f8] sm:$0xff]  ;;  %103 = vmatpush.msra.mxu0 %v1667_v0  ;;  %123 = vmatpush.msra.mxu1 %v1669_v1  ;;  %v1675_v3 = vld [vmem:[#allocation4 + $0x1c0] sm:$0xff]  ;;  %v1677_v4 = vld [vmem:[#allocation4 + $0x1c8] sm:$0xff] }
   0x7   :  { %v1679_v5 = vld [vmem:[#allocation4 + $0x1d8] sm:$0xff]  ;;  %163 = vmatpush.msra.mxu3 %v1671_v2  ;;  %v1682_v6 = vld [vmem:[#allocation4 + $0x1a0] sm:$0xff]  ;;  %v1684_v7 = vld [vmem:[#allocation4 + $0x1a8] sm:$0xff] }
   0x8   :  { %104 = vmatpush.msra.mxu0 %v1675_v3  ;;  %124 = vmatpush.msra.mxu1 %v1677_v4  ;;  %v1688_v8 = vld [vmem:[#allocation4 + $0x1b8] sm:$0xff]  ;;  %v1691_v9 = vld [vmem:[#allocation4 + $0x180] sm:$0xff]  ;;  %v1693_v10 = vld [vmem:[#allocation4 + $0x188] sm:$0xff] }
   0x9   :  { %164 = vmatpush.msra.mxu3 %v1679_v5  ;;  %v1697_v11 = vld [vmem:[#allocation4 + $0x198] sm:$0xff]  ;;  %v1700_v12 = vld [vmem:[#allocation4 + $0x160] sm:$0xff]  ;;  %v1702_v13 = vld [vmem:[#allocation4 + $0x168] sm:$0xff] }
   0xa   :  { %105 = vmatpush.msra.mxu0 %v1682_v6  ;;  %125 = vmatpush.msra.mxu1 %v1684_v7  ;;  %v1706_v14 = vld [vmem:[#allocation4 + $0x178] sm:$0xff]  ;;  %v1709_v15 = vld [vmem:[#allocation4 + $0x140] sm:$0xff]  ;;  %v1711_v16 = vld [vmem:[#allocation4 + $0x148] sm:$0xff] }
   0xb   :  { %165 = vmatpush.msra.mxu3 %v1688_v8  ;;  %v1713_v17 = vld [vmem:[#allocation4 + $0x1f0] sm:$0xff]  ;;  %v1717_v18 = vld [vmem:[#allocation4 + $0x158] sm:$0xff]  ;;  %v1722_v20 = vld [vmem:[#allocation4 + $0x120] sm:$0xff] }
   0xc   :  { %106 = vmatpush.msra.mxu0 %v1691_v9  ;;  %126 = vmatpush.msra.mxu1 %v1693_v10  ;;  %v1719_v19 = vld [vmem:[#allocation4 + $0x1d0] sm:$0xff]  ;;  %v1724_v21 = vld [vmem:[#allocation4 + $0x128] sm:$0xff]  ;;  %v1729_v22 = vld [vmem:[#allocation4 + $0x138] sm:$0xff] }
   0xd   :  { %166 = vmatpush.msra.mxu3 %v1697_v11  ;;  %143 = vmatpush.msra.mxu2 %v1713_v17  ;;  %v1731_v23 = vld [vmem:[#allocation4 + $0x1b0] sm:$0xff]  ;;  %v1734_v24 = vld [vmem:[#allocation4 + $0x100] sm:$0xff]  ;;  %v1736_v25 = vld [vmem:[#allocation4 + $0x108] sm:$0xff] }
   0xe   :  { %107 = vmatpush.msra.mxu0 %v1700_v12  ;;  %127 = vmatpush.msra.mxu1 %v1702_v13  ;;  %v1741_v26 = vld [vmem:[#allocation4 + $0x118] sm:$0xff]  ;;  %v1743_v27 = vld [vmem:[#allocation4 + $0x190] sm:$0xff]  ;;  %v1746_v28 = vld [vmem:[#allocation4 + $0xe0] sm:$0xff] }
   0xf   :  { %167 = vmatpush.msra.mxu3 %v1706_v14  ;;  %144 = vmatpush.msra.mxu2 %v1719_v19  ;;  %v1748_v29 = vld [vmem:[#allocation4 + $0xe8] sm:$0xff]  ;;  %v1753_v30 = vld [vmem:[#allocation4 + $0xf8] sm:$0xff]  ;;  %v1755_v31 = vld [vmem:[#allocation4 + $0x170] sm:$0xff] }
  0x10   :  { %108 = vmatpush.msra.mxu0 %v1709_v15  ;;  %128 = vmatpush.msra.mxu1 %v1711_v16  ;;  %v1758_v32 = vld [vmem:[#allocation4 + $0xc0] sm:$0xff]  ;;  %v1760_v33 = vld [vmem:[#allocation4 + $0xc8] sm:$0xff]  ;;  %v1765_v34 = vld [vmem:[#allocation4 + $0xd8] sm:$0xff] }
  0x11   :  { %168 = vmatpush.msra.mxu3 %v1717_v18  ;;  %145 = vmatpush.msra.mxu2 %v1731_v23  ;;  %2693 = vst [vmem:[#allocation8_spill] sm:$0xff] %v1765_v34  ;;  %v1767_v35 = vld [vmem:[#allocation4 + $0x150] sm:$0xff]  ;;  %v1770_v36 = vld [vmem:[#allocation4 + $0xa0] sm:$0xff]  ;;  %v1772_v37 = vld [vmem:[#allocation4 + $0xa8] sm:$0xff] }
  0x12   :  { %109 = vmatpush.msra.mxu0 %v1722_v20  ;;  %129 = vmatpush.msra.mxu1 %v1724_v21  ;;  %2694 = vst [vmem:[#allocation9_spill] sm:$0xff] %v1770_v36  ;;  %v1777_v38 = vld [vmem:[#allocation4 + $0xb8] sm:$0xff]  ;;  %v1779_v39 = vld [vmem:[#allocation4 + $0x130] sm:$0xff]  ;;  %v1782_v40 = vld [vmem:[#allocation4 + $0x80] sm:$0xff] }
  0x13   :  { %169 = vmatpush.msra.mxu3 %v1729_v22  ;;  %146 = vmatpush.msra.mxu2 %v1743_v27  ;;  %2695 = vst [vmem:[#allocation10_spill] sm:$0xff] %v1772_v37  ;;  %v1784_v41 = vld [vmem:[#allocation4 + $0x88] sm:$0xff]  ;;  %v1789_v42 = vld [vmem:[#allocation4 + $0x98] sm:$0xff]  ;;  %v1791_v43 = vld [vmem:[#allocation4 + $0x110] sm:$0xff] }
  0x14   :  { %110 = vmatpush.msra.mxu0 %v1734_v24  ;;  %130 = vmatpush.msra.mxu1 %v1736_v25  ;;  %2696 = vst [vmem:[#allocation11_spill] sm:$0xff] %v1777_v38  ;;  %v1794_v44 = vld [vmem:[#allocation4 + $0x60] sm:$0xff]  ;;  %v1796_v45 = vld [vmem:[#allocation4 + $0x68] sm:$0xff]  ;;  %v1801_v46 = vld [vmem:[#allocation4 + $0x78] sm:$0xff] }
  0x15   :  { %170 = vmatpush.msra.mxu3 %v1741_v26  ;;  %147 = vmatpush.msra.mxu2 %v1755_v31  ;;  %2697 = vst [vmem:[#allocation12_spill] sm:$0xff] %v1782_v40  ;;  %v1803_v47 = vld [vmem:[#allocation4 + $0xf0] sm:$0xff]  ;;  %v1806_v48 = vld [vmem:[#allocation4 + $0x40] sm:$0xff]  ;;  %v1808_v49 = vld [vmem:[#allocation4 + $0x48] sm:$0xff] }
  0x16   :  { %111 = vmatpush.msra.mxu0 %v1746_v28  ;;  %131 = vmatpush.msra.mxu1 %v1748_v29  ;;  %2698 = vst [vmem:[#allocation13_spill] sm:$0xff] %v1784_v41  ;;  %v1813_v50 = vld [vmem:[#allocation4 + $0x58] sm:$0xff]  ;;  %v1815_v51 = vld [vmem:[#allocation4 + $0xd0] sm:$0xff]  ;;  %v1818_v52 = vld [vmem:[#allocation4 + $0x20] sm:$0xff] }
  0x17   :  { %171 = vmatpush.msra.mxu3 %v1753_v30  ;;  %148 = vmatpush.msra.mxu2 %v1767_v35  ;;  %2699 = vst [vmem:[#allocation14_spill] sm:$0xff] %v1789_v42  ;;  %v1820_v53 = vld [vmem:[#allocation4 + $0x28] sm:$0xff]  ;;  %v1825_v54 = vld [vmem:[#allocation4 + $0x38] sm:$0xff]  ;;  %v1827_v55 = vld [vmem:[#allocation4 + $0xb0] sm:$0xff] }
  0x18   :  { %112 = vmatpush.msra.mxu0 %v1758_v32  ;;  %132 = vmatpush.msra.mxu1 %v1760_v33  ;;  %2700 = vst [vmem:[#allocation15_spill] sm:$0xff] %v1794_v44  ;;  %v1830_v56 = vld [vmem:[#allocation4] sm:$0xff]  ;;  %v1832_v57 = vld [vmem:[#allocation4 + $0x8] sm:$0xff]  ;;  %v1837_v58 = vld [vmem:[#allocation4 + $0x18] sm:$0xff] }
  0x19   :  { %172 = vmatpush.msra.mxu3 %v1765_v34  ;;  %2701 = vst [vmem:[#allocation16_spill] sm:$0xff] %v1796_v45  ;;  %149 = vmatpush.msra.mxu2 %v1779_v39  ;;  %v1843_v59 = vld [vmem:[#allocation4 + $0x90] sm:$0xff] }
  0x1a   :  { %113 = vmatpush.msra.mxu0 %v1770_v36  ;;  %133 = vmatpush.msra.mxu1 %v1772_v37  ;;  %2702 = vst [vmem:[#allocation17_spill] sm:$0xff] %v1801_v46  ;;  %v1846_v61 = vld [vmem:[#allocation4 + $0x70] sm:$0xff] }
  0x1b   :  { %173 = vmatpush.msra.mxu3 %v1777_v38  ;;  %2703 = vst [vmem:[#allocation18_spill] sm:$0xff] %v1806_v48  ;;  %150 = vmatpush.msra.mxu2 %v1791_v43  ;;  %v1850_v62 = vld [vmem:[#allocation4 + $0x50] sm:$0xff] }
  0x1c   :  { %114 = vmatpush.msra.mxu0 %v1782_v40  ;;  %134 = vmatpush.msra.mxu1 %v1784_v41  ;;  %2704 = vst [vmem:[#allocation19_spill] sm:$0xff] %v1808_v49  ;;  %v1856_v63 = vld [vmem:[#allocation4 + $0x30] sm:$0xff] }
  0x1d   :  { %174 = vmatpush.msra.mxu3 %v1789_v42  ;;  %2705 = vst [vmem:[#allocation20_spill] sm:$0xff] %v1813_v50  ;;  %151 = vmatpush.msra.mxu2 %v1803_v47 }
  0x1e   :  { %115 = vmatpush.msra.mxu0 %v1794_v44  ;;  %135 = vmatpush.msra.mxu1 %v1796_v45  ;;  %2706 = vst [vmem:[#allocation21_spill] sm:$0xff] %v1815_v51 }
  0x1f   :  { %175 = vmatpush.msra.mxu3 %v1801_v46  ;;  %2707 = vst [vmem:[#allocation22_spill] sm:$0xff] %v1818_v52  ;;  %152 = vmatpush.msra.mxu2 %v1815_v51 }
  0x20   :  { %2708 = vst [vmem:[#allocation23_spill] sm:$0xff] %v1820_v53  ;;  %116 = vmatpush.msra.mxu0 %v1806_v48  ;;  %136 = vmatpush.msra.mxu1 %v1808_v49 }
  0x21   :  { %2709 = vst [vmem:[#allocation24_spill] sm:$0xff] %v1825_v54  ;;  %176 = vmatpush.msra.mxu3 %v1813_v50  ;;  %153 = vmatpush.msra.mxu2 %v1827_v55 }
  0x22   :  { %2710 = vst [vmem:[#allocation25_spill] sm:$0xff] %v1827_v55  ;;  %117 = vmatpush.msra.mxu0 %v1818_v52  ;;  %137 = vmatpush.msra.mxu1 %v1820_v53 }
  0x23   :  { %2711 = vst [vmem:[#allocation26_spill] sm:$0xff] %v1830_v56  ;;  %177 = vmatpush.msra.mxu3 %v1825_v54  ;;  %154 = vmatpush.msra.mxu2 %v1843_v59 }
  0x24   :  { %2712 = vst [vmem:[#allocation27_spill] sm:$0xff] %v1832_v57  ;;  %118 = vmatpush.msra.mxu0 %v1830_v56  ;;  %138 = vmatpush.msra.mxu1 %v1832_v57 }
  0x25   :  { %2713 = vst [vmem:[#allocation28_spill] sm:$0xff] %v1837_v58  ;;  %178 = vmatpush.msra.mxu3 %v1837_v58  ;;  %119 = vmatmul.f32.vlgmr.msra.gmra.mxu0 %v1648_v60 }
  0x26   :  { %2714 = vst [vmem:[#allocation29_spill] sm:$0xff] %v1843_v59  ;;  %139 = vmatmul.f32.vlgmr.msra.gmra.mxu1 %v1648_v60  ;;  %179 = vmatmul.f32.vlgmr.msra.gmra.mxu3 %v1648_v60 }
  0x27   :  { %2715 = vst [vmem:[#allocation30_spill] sm:$0xff] %v1846_v61  ;;  %260 = vmatpush.msrb.mxu0 %v1667_v0  ;;  %280 = vmatpush.msrb.mxu1 %v1669_v1  ;;  %v1862_v0 = vld [vmem:[#allocation4 + $0x10] sm:$0xff] }
  0x28   :  { %2716 = vst [vmem:[#allocation31_spill] sm:$0xff] %v1850_v62  ;;  %320 = vmatpush.msrb.mxu3 %v1671_v2  ;;  %155 = vmatpush.msra.mxu2 %v1846_v61 }
  0x29   :  { %261 = vmatpush.msrb.mxu0 %v1675_v3  ;;  %2717 = vst [vmem:[#allocation32_spill] sm:$0xff] %v1856_v63  ;;  %281 = vmatpush.msrb.mxu1 %v1677_v4 }
  0x2a   :  { %321 = vmatpush.msrb.mxu3 %v1679_v5  ;;  %156 = vmatpush.msra.mxu2 %v1850_v62  ;;  %2718 = vst [vmem:[#allocation33_spill] sm:$0xff] %v1862_v0 }
  0x2b   :  { %262 = vmatpush.msrb.mxu0 %v1682_v6  ;;  %282 = vmatpush.msrb.mxu1 %v1684_v7 }
  0x2c   :  { %322 = vmatpush.msrb.mxu3 %v1688_v8  ;;  %157 = vmatpush.msra.mxu2 %v1856_v63 }
  0x2d   :  { %263 = vmatpush.msrb.mxu0 %v1691_v9  ;;  %283 = vmatpush.msrb.mxu1 %v1693_v10 }
  0x2e   :  { %323 = vmatpush.msrb.mxu3 %v1697_v11  ;;  %158 = vmatpush.msra.mxu2 %v1862_v0 }
  0x2f   :  { %264 = vmatpush.msrb.mxu0 %v1700_v12  ;;  %159 = vmatmul.f32.vlgmr.msra.gmra.mxu2 %v1648_v60  ;;  %v2719_v60 = vld [vmem:[#allocation7_spill] sm:$0xff] }
  0x30   :  { %284 = vmatpush.msrb.mxu1 %v1702_v13  ;;  %300 = vmatpush.msrb.mxu2 %v1713_v17 }
  0x31   :  { %324 = vmatpush.msrb.mxu3 %v1706_v14  ;;  %265 = vmatpush.msrb.mxu0 %v1709_v15 }
  0x32   :  { %285 = vmatpush.msrb.mxu1 %v1711_v16  ;;  %301 = vmatpush.msrb.mxu2 %v1719_v19 }
  0x33   :  { %325 = vmatpush.msrb.mxu3 %v1717_v18  ;;  %266 = vmatpush.msrb.mxu0 %v1722_v20 }
  0x34   :  { %286 = vmatpush.msrb.mxu1 %v1724_v21  ;;  %302 = vmatpush.msrb.mxu2 %v1731_v23 }
  0x35   :  { %326 = vmatpush.msrb.mxu3 %v1729_v22  ;;  %267 = vmatpush.msrb.mxu0 %v1734_v24 }
  0x36   :  { %287 = vmatpush.msrb.mxu1 %v1736_v25  ;;  %303 = vmatpush.msrb.mxu2 %v1743_v27 }
  0x37   :  { %327 = vmatpush.msrb.mxu3 %v1741_v26  ;;  %268 = vmatpush.msrb.mxu0 %v1746_v28 }
  0x38   :  { %288 = vmatpush.msrb.mxu1 %v1748_v29  ;;  %304 = vmatpush.msrb.mxu2 %v1755_v31 }
  0x39   :  { %328 = vmatpush.msrb.mxu3 %v1753_v30  ;;  %269 = vmatpush.msrb.mxu0 %v1758_v32 }
  0x3a   :  { %289 = vmatpush.msrb.mxu1 %v1760_v33  ;;  %305 = vmatpush.msrb.mxu2 %v1767_v35 }
  0x3b   :  { %329 = vmatpush.msrb.mxu3 %v1765_v34  ;;  %270 = vmatpush.msrb.mxu0 %v1770_v36 }
  0x3c   :  { %290 = vmatpush.msrb.mxu1 %v1772_v37  ;;  %306 = vmatpush.msrb.mxu2 %v1779_v39 }
  0x3d   :  { %330 = vmatpush.msrb.mxu3 %v1777_v38  ;;  %271 = vmatpush.msrb.mxu0 %v1782_v40 }
  0x3e   :  { %291 = vmatpush.msrb.mxu1 %v1784_v41  ;;  %307 = vmatpush.msrb.mxu2 %v1791_v43 }
  0x3f   :  { %331 = vmatpush.msrb.mxu3 %v1789_v42  ;;  %272 = vmatpush.msrb.mxu0 %v1794_v44 }
  0x40   :  { %292 = vmatpush.msrb.mxu1 %v1796_v45  ;;  %308 = vmatpush.msrb.mxu2 %v1803_v47 }
  0x41   :  { %332 = vmatpush.msrb.mxu3 %v1801_v46  ;;  %273 = vmatpush.msrb.mxu0 %v1806_v48 }
  0x42   :  { %293 = vmatpush.msrb.mxu1 %v1808_v49  ;;  %309 = vmatpush.msrb.mxu2 %v1815_v51 }
  0x43   :  { %333 = vmatpush.msrb.mxu3 %v1813_v50  ;;  %274 = vmatpush.msrb.mxu0 %v1818_v52 }
  0x44   :  { %294 = vmatpush.msrb.mxu1 %v1820_v53  ;;  %310 = vmatpush.msrb.mxu2 %v1827_v55 }
  0x45   :  { %334 = vmatpush.msrb.mxu3 %v1825_v54  ;;  %275 = vmatpush.msrb.mxu0 %v1830_v56 }
  0x46   :  { %295 = vmatpush.msrb.mxu1 %v1832_v57  ;;  %311 = vmatpush.msrb.mxu2 %v1843_v59 }
  0x47   :  { %335 = vmatpush.msrb.mxu3 %v1837_v58  ;;  %418 = vmatpush.msra.mxu0 %v2719_v60 }
  0x48   :  { %438 = vmatpush.msra.mxu1 %v1669_v1  ;;  %312 = vmatpush.msrb.mxu2 %v1846_v61 }
  0x49   :  { %478 = vmatpush.msra.mxu3 %v1671_v2  ;;  %419 = vmatpush.msra.mxu0 %v1675_v3 }
  0x4a   :  { %439 = vmatpush.msra.mxu1 %v1677_v4  ;;  %313 = vmatpush.msrb.mxu2 %v1850_v62 }
  0x4b   :  { %479 = vmatpush.msra.mxu3 %v1679_v5  ;;  %420 = vmatpush.msra.mxu0 %v1682_v6 }
  0x4c   :  { %440 = vmatpush.msra.mxu1 %v1684_v7  ;;  %314 = vmatpush.msrb.mxu2 %v1856_v63 }
  0x4d   :  { %480 = vmatpush.msra.mxu3 %v1688_v8  ;;  %421 = vmatpush.msra.mxu0 %v1691_v9 }
  0x4e   :  { %441 = vmatpush.msra.mxu1 %v1693_v10  ;;  %315 = vmatpush.msrb.mxu2 %v1862_v0 }
  0x4f   :  { %481 = vmatpush.msra.mxu3 %v1697_v11  ;;  %422 = vmatpush.msra.mxu0 %v1700_v12 }
  0x50   :  { %458 = vmatpush.msra.mxu2 %v1713_v17  ;;  %442 = vmatpush.msra.mxu1 %v1702_v13 }
  0x51   :  { %482 = vmatpush.msra.mxu3 %v1706_v14  ;;  %423 = vmatpush.msra.mxu0 %v1709_v15 }
  0x52   :  { %459 = vmatpush.msra.mxu2 %v1719_v19  ;;  %443 = vmatpush.msra.mxu1 %v1711_v16 }
  0x53   :  { %483 = vmatpush.msra.mxu3 %v1717_v18  ;;  %424 = vmatpush.msra.mxu0 %v1722_v20 }
  0x54   :  { %460 = vmatpush.msra.mxu2 %v1731_v23  ;;  %444 = vmatpush.msra.mxu1 %v1724_v21 }
  0x55   :  { %484 = vmatpush.msra.mxu3 %v1729_v22  ;;  %425 = vmatpush.msra.mxu0 %v1734_v24 }
  0x56   :  { %461 = vmatpush.msra.mxu2 %v1743_v27  ;;  %445 = vmatpush.msra.mxu1 %v1736_v25 }
  0x57   :  { %485 = vmatpush.msra.mxu3 %v1741_v26  ;;  %426 = vmatpush.msra.mxu0 %v1746_v28 }
  0x58   :  { %462 = vmatpush.msra.mxu2 %v1755_v31  ;;  %446 = vmatpush.msra.mxu1 %v1748_v29 }
  0x59   :  { %486 = vmatpush.msra.mxu3 %v1753_v30  ;;  %427 = vmatpush.msra.mxu0 %v1758_v32 }
  0x5a   :  { %463 = vmatpush.msra.mxu2 %v1767_v35  ;;  %447 = vmatpush.msra.mxu1 %v1760_v33 }
  0x5b   :  { %487 = vmatpush.msra.mxu3 %v1765_v34  ;;  %428 = vmatpush.msra.mxu0 %v1770_v36 }
  0x5c   :  { %464 = vmatpush.msra.mxu2 %v1779_v39  ;;  %448 = vmatpush.msra.mxu1 %v1772_v37 }
  0x5d   :  { %488 = vmatpush.msra.mxu3 %v1777_v38  ;;  %429 = vmatpush.msra.mxu0 %v1782_v40 }
  0x5e   :  { %465 = vmatpush.msra.mxu2 %v1791_v43  ;;  %449 = vmatpush.msra.mxu1 %v1784_v41 }
  0x5f   :  { %489 = vmatpush.msra.mxu3 %v1789_v42  ;;  %430 = vmatpush.msra.mxu0 %v1794_v44 }
  0x60   :  { %466 = vmatpush.msra.mxu2 %v1803_v47  ;;  %450 = vmatpush.msra.mxu1 %v1796_v45 }
  0x61   :  { %490 = vmatpush.msra.mxu3 %v1801_v46  ;;  %431 = vmatpush.msra.mxu0 %v1806_v48 }
  0x62   :  { %467 = vmatpush.msra.mxu2 %v1815_v51  ;;  %451 = vmatpush.msra.mxu1 %v1808_v49 }
  0x63   :  { %491 = vmatpush.msra.mxu3 %v1813_v50  ;;  %432 = vmatpush.msra.mxu0 %v1818_v52 }
  0x64   :  { %468 = vmatpush.msra.mxu2 %v1827_v55  ;;  %452 = vmatpush.msra.mxu1 %v1820_v53 }
  0x65   :  { %492 = vmatpush.msra.mxu3 %v1825_v54  ;;  %433 = vmatpush.msra.mxu0 %v1830_v56  ;;  %v99_v54 = vld [vmem:[%s2583_s0] sm:$0xff]  ;;  %v100_v56 = vld [vmem:[%s2583_s0 + $0x8] sm:$0xff] }
  0x66   :  { %469 = vmatpush.msra.mxu2 %v1843_v59  ;;  %453 = vmatpush.msra.mxu1 %v1832_v57 }
  0x67   :  { %493 = vmatpush.msra.mxu3 %v1837_v58 }
  0x68   :  { %470 = vmatpush.msra.mxu2 %v1846_v61 }
  0x6a   :  { %471 = vmatpush.msra.mxu2 %v1850_v62 }
  0x6c   :  { %472 = vmatpush.msra.mxu2 %v1856_v63  ;;  %v102_v63 = vld [vmem:[%s2583_s0 + $0x18] sm:$0xff] }
  0x6e   :  { %473 = vmatpush.msra.mxu2 %v1862_v0 }
  0xa2   :  { %v120_v53 = vpop.f32.mrf.mxu0 }
  0xa3   :  { %v183_v57 = vadd.f32 %v120_v53, %v99_v54  ;;  %v140_v52 = vpop.f32.mrf.mxu1 }
  0xa4   :  { %v184_v58 = vadd.f32 %v140_v52, %v100_v56  ;;  %v101_v52 = vld [vmem:[%s2583_s0 + $0x10] sm:$0xff] }
  0xa5   :  { %v1364_v50 = vmul.f32 -1.442695, %v183_v57 }
  0xa6   :  { %v1365_v49 = vmul.f32 -1.442695, %v184_v58 }
  0xa7   :  { %1427 = vpow2.f32 %v1364_v50 }
  0xa8   :  { %1429 = vpow2.f32 %v1365_v49 }
  0xa9   :  { %v180_v0 = vpop.f32.mrf.mxu3 }
  0xaa   :  { %v186_v62 = vadd.f32 %v180_v0, %v102_v63 }
  0xac   :  { %v1366_v48 = vmul.f32 -1.442695, %v186_v62 }
  0xad   :  { %v1428_v46 = vpop.eup %1427 }
  0xae   :  { %v1430_v61 = vpop.eup %1429  ;;  %v190_v45 = vadd.f32 1.0, %v1428_v46  ;;  %1431 = vpow2.f32 %v1366_v48 }
  0xaf   :  { %v209_v44 = vadd.f32 1.0, %v1430_v61 }
  0xb0   :  { %1433 = vrcp.f32 %v190_v45  ;;  %v202_v48 = vand.u32 2147483648, %v190_v45  ;;  %v200_v42 = vand.u32 2147483647, %v190_v45  ;;  %vm196_vm2 = vweird.f32 %v190_v45 }
  0xb1   :  { %1435 = vrcp.f32 %v209_v44  ;;  %v221_v61 = vand.u32 2147483648, %v209_v44  ;;  %v219_v41 = vand.u32 2147483647, %v209_v44  ;;  %vm215_vm3 = vweird.f32 %v209_v44 }
  0xb2   :  { %v160_v50 = vpop.f32.mrf.mxu2  ;;  %vm201_vm5 = vcmp.eq.f32.partialorder %v200_v42, 8.507059e+37 }
  0xb3   :  { %v185_v54 = vadd.f32 %v160_v50, %v101_v52  ;;  %vm220_vm7 = vcmp.eq.f32.partialorder %v219_v41, 8.507059e+37 }
  0xb4   :  { %v1432_v53 = vpop.eup %1431 }
  0xb5   :  { %v229_v56 = vadd.f32 1.0, %v1432_v53  ;;  %v203_v53 = vor.u32 1.1754944e-38, %v202_v48  ;;  %v2727_v48 = vld [vmem:[#allocation13_spill] sm:$0xff] }
  0xb6   :  { %v1434_v57 = vpop.eup %1433 }
  0xb7   :  { %v1436_v49 = vpop.eup %1435  ;;  %v192_v58 = vmul.f32 %v1434_v57, %v190_v45  ;;  %1437 = vrcp.f32 %v229_v56  ;;  %vm197_vm0 = vweird.f32 %v1434_v57  ;;  %v241_v45 = vand.u32 2147483648, %v229_v56 }
  0xb8   :  { %v211_v0 = vmul.f32 %v1436_v49, %v209_v44  ;;  %1439 = vtanh.f32 %v185_v54  ;;  %vm216_vm1 = vweird.f32 %v1436_v49  ;;  %vm198_vm4 = vmor %vm196_vm2, %vm197_vm0  ;;  %v222_v54 = vor.u32 1.1754944e-38, %v221_v61  ;;  %v2728_v61 = vld [vmem:[#allocation29_spill] sm:$0xff] }
  0xb9   :  { %v193_v62 = vsub.f32 1.0, %v192_v58  ;;  %vm217_vm6 = vmor %vm215_vm3, %vm216_vm1  ;;  %vm235_vm9 = vweird.f32 %v229_v56  ;;  %v242_v42 = vor.u32 1.1754944e-38, %v241_v45  ;;  %v2738_v45 = vld [vmem:[#allocation22_spill] sm:$0xff] }
  0xba   :  { %v212_v46 = vsub.f32 1.0, %v211_v0 }
  0xbb   :  { %v194_v63 = vmul.f32 %v1434_v57, %v193_v62 }
  0xbc   :  { %v213_v59 = vmul.f32 %v1436_v49, %v212_v46 }
  0xbd   :  { %v1438_v40 = vpop.eup %1437  ;;  %v195_v38 = vadd.f32 %v1434_v57, %v194_v63 }
  0xbe   :  { %v1440_v52 = vpop.eup %1439  ;;  %v231_v50 = vmul.f32 %v1438_v40, %v229_v56  ;;  %v214_v55 = vadd.f32 %v1436_v49, %v213_v59  ;;  %vm236_vm8 = vweird.f32 %v1438_v40  ;;  %v239_v59 = vand.u32 2147483647, %v229_v56  ;;  %v2725_v56 = vld [vmem:[#allocation11_spill] sm:$0xff] }
  0xbf   :  { %v199_v58 = vsel %vm198_vm4, %v1434_v57, %v195_v38  ;;  %vm237_vm10 = vmor %vm235_vm9, %vm236_vm8 }
  0xc0   :  { %v232_v0 = vsub.f32 1.0, %v231_v50  ;;  %v204_v62 = vsel %vm201_vm5, %v203_v53, %v199_v58  ;;  %v218_v37 = vsel %vm217_vm6, %v1436_v49, %v214_v55  ;;  %vm240_vm11 = vcmp.eq.f32.partialorder %v239_v59, 8.507059e+37  ;;  %v2726_v49 = vld [vmem:[#allocation12_spill] sm:$0xff]  ;;  %v2730_v50 = vld [vmem:[#allocation15_spill] sm:$0xff]  ;;  %v2733_v58 = vld [vmem:[#allocation17_spill] sm:$0xff] }
  0xc1   :  { %v223_v46 = vsel %vm220_vm7, %v222_v54, %v218_v37  ;;  %v246_v36 = vmul.f32 %v1440_v52, %v204_v62  ;;  %v2722_v37 = vld [vmem:[#allocation9_spill] sm:$0xff]  ;;  %v2729_v52 = vld [vmem:[#allocation14_spill] sm:$0xff]  ;;  %v2731_v53 = vld [vmem:[#allocation16_spill] sm:$0xff] }
  0xc2   :  { %v233_v34 = vmul.f32 %v1438_v40, %v232_v0  ;;  %v245_v51 = vmul.f32 0.0, %v223_v46  ;;  %v2732_v54 = vld [vmem:[#allocation30_spill] sm:$0xff]  ;;  %v2735_v62 = vld [vmem:[#allocation19_spill] sm:$0xff] }
  0xc3   :  { %v2734_v0 = vld [vmem:[#allocation18_spill] sm:$0xff]  ;;  %v2736_v46 = vld [vmem:[#allocation31_spill] sm:$0xff] }
  0xc4   :  { %v1999_v63 = vadd.f32 %v246_v36, %v245_v51  ;;  %v234_v44 = vadd.f32 %v1438_v40, %v233_v34  ;;  %v2720_v34 = vld [vmem:[#allocation21_spill] sm:$0xff]  ;;  %v2721_v36 = vld [vmem:[#allocation8_spill] sm:$0xff]  ;;  %v2739_v59 = vld [vmem:[#allocation23_spill] sm:$0xff] }
  0xc5   :  { %v2724_v51 = vld [vmem:[#allocation25_spill] sm:$0xff] }
  0xc6   :  { %1441 = vtanh.f32 %v1999_v63  ;;  %v238_v38 = vsel %vm237_vm10, %v1438_v40, %v234_v44  ;;  %v2723_v40 = vld [vmem:[#allocation10_spill] sm:$0xff]  ;;  %v2737_v44 = vld [vmem:[#allocation20_spill] sm:$0xff] }
  0xc7   :  { %v243_v55 = vsel %vm240_vm11, %v242_v42, %v238_v38  ;;  %v2740_v38 = vld [vmem:[#allocation32_spill] sm:$0xff] }
  0xc8   :  { %v2741_v42 = vld [vmem:[#allocation24_spill] sm:$0xff] }
  0xcc   :  { %v1442_v57 = vpop.eup %1441 }
  0xcd   :  { %v249_v41 = vmul.f32 %v1442_v57, %v243_v55  ;;  %v2742_v57 = vld [vmem:[#allocation26_spill] sm:$0xff]  ;;  %v2743_v55 = vld [vmem:[#allocation27_spill] sm:$0xff] }
  0xcf   :  { %252 = vst [vmem:[%s2585_s2] sm:$0xff] %v249_v41  ;;  %276 = vmatmul.f32.vlgmr.msrb.gmra.mxu0 %v249_v41  ;;  %296 = vmatmul.f32.vlgmr.msrb.gmra.mxu1 %v249_v41 }
  0xd0   :  { %316 = vmatmul.f32.vlgmr.msrb.gmra.mxu2 %v249_v41  ;;  %336 = vmatmul.f32.vlgmr.msrb.gmra.mxu3 %v249_v41  ;;  %v2744_v41 = vld [vmem:[#allocation33_spill] sm:$0xff] }
  0xd1   :  { %576 = vmatpush.msrb.mxu0 %v2719_v60  ;;  %596 = vmatpush.msrb.mxu1 %v1669_v1 }
  0xd2   :  { %616 = vmatpush.msrb.mxu2 %v1713_v17  ;;  %636 = vmatpush.msrb.mxu3 %v1671_v2 }
  0xd3   :  { %577 = vmatpush.msrb.mxu0 %v1675_v3  ;;  %597 = vmatpush.msrb.mxu1 %v1677_v4 }
  0xd4   :  { %617 = vmatpush.msrb.mxu2 %v1719_v19  ;;  %637 = vmatpush.msrb.mxu3 %v1679_v5 }
  0xd5   :  { %578 = vmatpush.msrb.mxu0 %v1682_v6  ;;  %598 = vmatpush.msrb.mxu1 %v1684_v7 }
  0xd6   :  { %618 = vmatpush.msrb.mxu2 %v1731_v23  ;;  %638 = vmatpush.msrb.mxu3 %v1688_v8 }
  0xd7   :  { %579 = vmatpush.msrb.mxu0 %v1691_v9  ;;  %599 = vmatpush.msrb.mxu1 %v1693_v10 }
  0xd8   :  { %619 = vmatpush.msrb.mxu2 %v1743_v27  ;;  %639 = vmatpush.msrb.mxu3 %v1697_v11 }
  0xd9   :  { %580 = vmatpush.msrb.mxu0 %v1700_v12  ;;  %600 = vmatpush.msrb.mxu1 %v1702_v13 }
  0xda   :  { %620 = vmatpush.msrb.mxu2 %v1755_v31  ;;  %640 = vmatpush.msrb.mxu3 %v1706_v14 }
  0xdb   :  { %581 = vmatpush.msrb.mxu0 %v1709_v15  ;;  %601 = vmatpush.msrb.mxu1 %v1711_v16 }
  0xdc   :  { %621 = vmatpush.msrb.mxu2 %v1767_v35  ;;  %641 = vmatpush.msrb.mxu3 %v1717_v18 }
  0xdd   :  { %582 = vmatpush.msrb.mxu0 %v1722_v20  ;;  %602 = vmatpush.msrb.mxu1 %v1724_v21 }
  0xde   :  { %622 = vmatpush.msrb.mxu2 %v1779_v39  ;;  %642 = vmatpush.msrb.mxu3 %v1729_v22 }
  0xdf   :  { %583 = vmatpush.msrb.mxu0 %v1734_v24  ;;  %603 = vmatpush.msrb.mxu1 %v1736_v25 }
  0xe0   :  { %623 = vmatpush.msrb.mxu2 %v1791_v43  ;;  %643 = vmatpush.msrb.mxu3 %v1741_v26 }
  0xe1   :  { %584 = vmatpush.msrb.mxu0 %v1746_v28  ;;  %604 = vmatpush.msrb.mxu1 %v1748_v29 }
  0xe2   :  { %624 = vmatpush.msrb.mxu2 %v1803_v47  ;;  %644 = vmatpush.msrb.mxu3 %v1753_v30 }
  0xe3   :  { %585 = vmatpush.msrb.mxu0 %v1758_v32  ;;  %605 = vmatpush.msrb.mxu1 %v1760_v33 }
  0xe4   :  { %625 = vmatpush.msrb.mxu2 %v2720_v34  ;;  %645 = vmatpush.msrb.mxu3 %v2721_v36 }
  0xe5   :  { %586 = vmatpush.msrb.mxu0 %v2722_v37  ;;  %606 = vmatpush.msrb.mxu1 %v2723_v40 }
  0xe6   :  { %626 = vmatpush.msrb.mxu2 %v2724_v51  ;;  %646 = vmatpush.msrb.mxu3 %v2725_v56 }
  0xe7   :  { %587 = vmatpush.msrb.mxu0 %v2726_v49  ;;  %607 = vmatpush.msrb.mxu1 %v2727_v48 }
  0xe8   :  { %627 = vmatpush.msrb.mxu2 %v2728_v61  ;;  %647 = vmatpush.msrb.mxu3 %v2729_v52 }
  0xe9   :  { %588 = vmatpush.msrb.mxu0 %v2730_v50  ;;  %608 = vmatpush.msrb.mxu1 %v2731_v53 }
  0xea   :  { %628 = vmatpush.msrb.mxu2 %v2732_v54  ;;  %648 = vmatpush.msrb.mxu3 %v2733_v58 }
  0xeb   :  { %589 = vmatpush.msrb.mxu0 %v2734_v0  ;;  %609 = vmatpush.msrb.mxu1 %v2735_v62  ;;  %v2745_v0 = vld [vmem:[#allocation28_spill] sm:$0xff] }
  0xec   :  { %629 = vmatpush.msrb.mxu2 %v2736_v46  ;;  %649 = vmatpush.msrb.mxu3 %v2737_v44  ;;  %v1367_v44 = vld [vmem:[%s2583_s0 + $0x20] sm:$0xff] }
  0xed   :  { %590 = vmatpush.msrb.mxu0 %v2738_v45  ;;  %610 = vmatpush.msrb.mxu1 %v2739_v59  ;;  %v1368_v59 = vld [vmem:[%s2583_s0 + $0x28] sm:$0xff] }
  0xee   :  { %630 = vmatpush.msrb.mxu2 %v2740_v38  ;;  %650 = vmatpush.msrb.mxu3 %v2741_v42 }
  0xef   :  { %591 = vmatpush.msrb.mxu0 %v2742_v57  ;;  %611 = vmatpush.msrb.mxu1 %v2743_v55 }
  0xf0   :  { %631 = vmatpush.msrb.mxu2 %v2744_v41  ;;  %651 = vmatpush.msrb.mxu3 %v2745_v0  ;;  %v1370_v41 = vld [vmem:[%s2583_s0 + $0x38] sm:$0xff] }
 0x14c   :  { %v277_v45 = vpop.f32.mrf.mxu0  ;;  %v297_v38 = vpop.f32.mrf.mxu1 }
 0x14d   :  { %v340_v46 = vadd.f32 %v1367_v44, %v277_v45  ;;  %v341_v42 = vadd.f32 %v1368_v59, %v297_v38 }
 0x14f   :  { %v1371_v62 = vmul.f32 -1.442695, %v340_v46  ;;  %v1372_v57 = vmul.f32 -1.442695, %v341_v42  ;;  %v1369_v46 = vld [vmem:[%s2583_s0 + $0x30] sm:$0xff] }
 0x151   :  { %1443 = vpow2.f32 %v1371_v62 }
 0x152   :  { %1445 = vpow2.f32 %v1372_v57 }
 0x153   :  { %v337_v0 = vpop.f32.mrf.mxu3  ;;  %v317_v62 = vpop.f32.mrf.mxu2 }
 0x154   :  { %v343_v55 = vadd.f32 %v1370_v41, %v337_v0  ;;  %v342_v38 = vadd.f32 %v1369_v46, %v317_v62 }
 0x156   :  { %v1373_v58 = vmul.f32 -1.442695, %v343_v55 }
 0x157   :  { %v1444_v54 = vpop.eup %1443 }
 0x158   :  { %v1446_v53 = vpop.eup %1445  ;;  %v347_v50 = vadd.f32 1.0, %v1444_v54  ;;  %1447 = vpow2.f32 %v1373_v58 }
 0x159   :  { %v366_v52 = vadd.f32 1.0, %v1446_v53 }
 0x15a   :  { %1449 = vrcp.f32 %v347_v50  ;;  %v359_v54 = vand.u32 2147483648, %v347_v50  ;;  %v357_v61 = vand.u32 2147483647, %v347_v50  ;;  %vm353_vm14 = vweird.f32 %v347_v50 }
 0x15b   :  { %1451 = vrcp.f32 %v366_v52  ;;  %v378_v53 = vand.u32 2147483648, %v366_v52  ;;  %v376_v49 = vand.u32 2147483647, %v366_v52  ;;  %vm372_vm15 = vweird.f32 %v366_v52 }
 0x15c   :  { %v360_v46 = vor.u32 1.1754944e-38, %v359_v54  ;;  %vm358_vm2 = vcmp.eq.f32.partialorder %v357_v61, 8.507059e+37 }
 0x15d   :  { %vm377_vm3 = vcmp.eq.f32.partialorder %v376_v49, 8.507059e+37 }
 0x15e   :  { %v1448_v44 = vpop.eup %1447 }
 0x15f   :  { %v386_v45 = vadd.f32 1.0, %v1448_v44 }
 0x160   :  { %v1450_v59 = vpop.eup %1449 }
 0x161   :  { %v1452_v42 = vpop.eup %1451  ;;  %v349_v57 = vmul.f32 %v1450_v59, %v347_v50  ;;  %1453 = vrcp.f32 %v386_v45  ;;  %vm354_vm12 = vweird.f32 %v1450_v59  ;;  %vm392_vm5 = vweird.f32 %v386_v45 }
 0x162   :  { %v368_v0 = vmul.f32 %v1452_v42, %v366_v52  ;;  %1455 = vtanh.f32 %v342_v38  ;;  %vm373_vm13 = vweird.f32 %v1452_v42  ;;  %vm355_vm0 = vmor %vm353_vm14, %vm354_vm12 }
 0x163   :  { %v350_v55 = vsub.f32 1.0, %v349_v57  ;;  %vm374_vm1 = vmor %vm372_vm15, %vm373_vm13  ;;  %v379_v57 = vor.u32 1.1754944e-38, %v378_v53 }
 0x164   :  { %v369_v41 = vsub.f32 1.0, %v368_v0 }
 0x165   :  { %v351_v58 = vmul.f32 %v1450_v59, %v350_v55 }
 0x166   :  { %v370_v48 = vmul.f32 %v1452_v42, %v369_v41 }
 0x167   :  { %v1454_v56 = vpop.eup %1453  ;;  %v352_v51 = vadd.f32 %v1450_v59, %v351_v58 }
 0x168   :  { %v371_v62 = vadd.f32 %v1452_v42, %v370_v48  ;;  %v388_v44 = vmul.f32 %v1454_v56, %v386_v45  ;;  %v1456_v38 = vpop.eup %1455  ;;  %vm393_vm4 = vweird.f32 %v1454_v56  ;;  %v398_v48 = vand.u32 2147483648, %v386_v45 }
 0x169   :  { %v356_v0 = vsel %vm355_vm0, %v1450_v59, %v352_v51  ;;  %v396_v51 = vand.u32 2147483647, %v386_v45  ;;  %vm394_vm6 = vmor %vm392_vm5, %vm393_vm4 }
 0x16a   :  { %v361_v40 = vsel %vm358_vm2, %v360_v46, %v356_v0  ;;  %v375_v55 = vsel %vm374_vm1, %v1452_v42, %v371_v62  ;;  %v389_v37 = vsub.f32 1.0, %v388_v44  ;;  %v399_v59 = vor.u32 1.1754944e-38, %v398_v48 }
 0x16b   :  { %v380_v41 = vsel %vm377_vm3, %v379_v57, %v375_v55  ;;  %v403_v36 = vmul.f32 %v1456_v38, %v361_v40  ;;  %vm397_vm7 = vcmp.eq.f32.partialorder %v396_v51, 8.507059e+37  ;;  %v1377_v40 = vld [vmem:[%s2583_s0 + $0x50] sm:$0xff] }
 0x16c   :  { %v402_v34 = vmul.f32 %v380_v41, %v1999_v63  ;;  %v390_v58 = vmul.f32 %v1454_v56, %v389_v37 }
 0x16e   :  { %v2082_v50 = vadd.f32 %v403_v36, %v402_v34  ;;  %v391_v52 = vadd.f32 %v1454_v56, %v390_v58 }
 0x170   :  { %1457 = vtanh.f32 %v2082_v50  ;;  %v395_v61 = vsel %vm394_vm6, %v1454_v56, %v391_v52 }
 0x171   :  { %v400_v42 = vsel %vm397_vm7, %v399_v59, %v395_v61 }
 0x176   :  { %v1458_v49 = vpop.eup %1457 }
 0x177   :  { %v406_v54 = vmul.f32 %v1458_v49, %v400_v42 }
 0x179   :  { %1374 = vst [vmem:[%s2585_s2 + $0x8] sm:$0xff] %v406_v54  ;;  %434 = vmatmul.f32.vlgmr.msra.gmra.mxu0 %v406_v54  ;;  %454 = vmatmul.f32.vlgmr.msra.gmra.mxu1 %v406_v54 }
 0x17a   :  { %474 = vmatmul.f32.vlgmr.msra.gmra.mxu2 %v406_v54  ;;  %494 = vmatmul.f32.vlgmr.msra.gmra.mxu3 %v406_v54 }
 0x17b   :  { %734 = vmatpush.msra.mxu0 %v2719_v60  ;;  %754 = vmatpush.msra.mxu1 %v1669_v1  ;;  %v2746_v1 = vld [vmem:[#allocation21_spill] sm:$0xff] }
 0x17c   :  { %774 = vmatpush.msra.mxu2 %v1713_v17  ;;  %794 = vmatpush.msra.mxu3 %v1671_v2  ;;  %v2747_v2 = vld [vmem:[#allocation8_spill] sm:$0xff]  ;;  %v2762_v17 = vld [vmem:[#allocation31_spill] sm:$0xff] }
 0x17d   :  { %735 = vmatpush.msra.mxu0 %v1675_v3  ;;  %755 = vmatpush.msra.mxu1 %v1677_v4  ;;  %v2748_v3 = vld [vmem:[#allocation9_spill] sm:$0xff]  ;;  %v2749_v4 = vld [vmem:[#allocation10_spill] sm:$0xff] }
 0x17e   :  { %775 = vmatpush.msra.mxu2 %v1719_v19  ;;  %795 = vmatpush.msra.mxu3 %v1679_v5  ;;  %v2750_v5 = vld [vmem:[#allocation25_spill] sm:$0xff]  ;;  %v2764_v19 = vld [vmem:[#allocation22_spill] sm:$0xff] }
 0x17f   :  { %736 = vmatpush.msra.mxu0 %v1682_v6  ;;  %756 = vmatpush.msra.mxu1 %v1684_v7  ;;  %v2751_v6 = vld [vmem:[#allocation11_spill] sm:$0xff]  ;;  %v2752_v7 = vld [vmem:[#allocation12_spill] sm:$0xff] }
 0x180   :  { %776 = vmatpush.msra.mxu2 %v1731_v23  ;;  %796 = vmatpush.msra.mxu3 %v1688_v8  ;;  %v2753_v8 = vld [vmem:[#allocation13_spill] sm:$0xff]  ;;  %v2768_v23 = vld [vmem:[#allocation26_spill] sm:$0xff] }
 0x181   :  { %737 = vmatpush.msra.mxu0 %v1691_v9  ;;  %757 = vmatpush.msra.mxu1 %v1693_v10  ;;  %v2754_v9 = vld [vmem:[#allocation29_spill] sm:$0xff]  ;;  %v2755_v10 = vld [vmem:[#allocation14_spill] sm:$0xff] }
 0x182   :  { %777 = vmatpush.msra.mxu2 %v1743_v27  ;;  %797 = vmatpush.msra.mxu3 %v1697_v11  ;;  %v2756_v11 = vld [vmem:[#allocation15_spill] sm:$0xff] }
 0x183   :  { %738 = vmatpush.msra.mxu0 %v1700_v12  ;;  %758 = vmatpush.msra.mxu1 %v1702_v13  ;;  %v2757_v12 = vld [vmem:[#allocation16_spill] sm:$0xff]  ;;  %v2758_v13 = vld [vmem:[#allocation30_spill] sm:$0xff]  ;;  %v1375_v27 = vld [vmem:[%s2583_s0 + $0x40] sm:$0xff] }
 0x184   :  { %778 = vmatpush.msra.mxu2 %v1755_v31  ;;  %798 = vmatpush.msra.mxu3 %v1706_v14  ;;  %v2759_v14 = vld [vmem:[#allocation17_spill] sm:$0xff] }
 0x185   :  { %739 = vmatpush.msra.mxu0 %v1709_v15  ;;  %759 = vmatpush.msra.mxu1 %v1711_v16  ;;  %v2760_v15 = vld [vmem:[#allocation18_spill] sm:$0xff]  ;;  %v2761_v16 = vld [vmem:[#allocation19_spill] sm:$0xff] }
 0x186   :  { %779 = vmatpush.msra.mxu2 %v1767_v35  ;;  %799 = vmatpush.msra.mxu3 %v1717_v18  ;;  %v2763_v18 = vld [vmem:[#allocation20_spill] sm:$0xff] }
 0x187   :  { %740 = vmatpush.msra.mxu0 %v1722_v20  ;;  %760 = vmatpush.msra.mxu1 %v1724_v21  ;;  %v2765_v20 = vld [vmem:[#allocation23_spill] sm:$0xff]  ;;  %v2766_v21 = vld [vmem:[#allocation32_spill] sm:$0xff] }
 0x188   :  { %780 = vmatpush.msra.mxu2 %v1779_v39  ;;  %800 = vmatpush.msra.mxu3 %v1729_v22  ;;  %v2767_v22 = vld [vmem:[#allocation24_spill] sm:$0xff]  ;;  %v1378_v39 = vld [vmem:[%s2583_s0 + $0x58] sm:$0xff] }
 0x189   :  { %741 = vmatpush.msra.mxu0 %v1734_v24  ;;  %761 = vmatpush.msra.mxu1 %v1736_v25  ;;  %v2769_v24 = vld [vmem:[#allocation27_spill] sm:$0xff]  ;;  %v2770_v25 = vld [vmem:[#allocation33_spill] sm:$0xff] }
 0x18a   :  { %781 = vmatpush.msra.mxu2 %v1791_v43  ;;  %801 = vmatpush.msra.mxu3 %v1741_v26  ;;  %v2771_v26 = vld [vmem:[#allocation28_spill] sm:$0xff] }
 0x18b   :  { %742 = vmatpush.msra.mxu0 %v1746_v28  ;;  %762 = vmatpush.msra.mxu1 %v1748_v29  ;;  %v1376_v28 = vld [vmem:[%s2583_s0 + $0x48] sm:$0xff] }
 0x18c   :  { %782 = vmatpush.msra.mxu2 %v1803_v47  ;;  %802 = vmatpush.msra.mxu3 %v1753_v30 }
 0x18d   :  { %743 = vmatpush.msra.mxu0 %v1758_v32  ;;  %763 = vmatpush.msra.mxu1 %v1760_v33 }
 0x18e   :  { %783 = vmatpush.msra.mxu2 %v2746_v1  ;;  %803 = vmatpush.msra.mxu3 %v2747_v2 }
 0x18f   :  { %744 = vmatpush.msra.mxu0 %v2748_v3  ;;  %764 = vmatpush.msra.mxu1 %v2749_v4 }
 0x190   :  { %784 = vmatpush.msra.mxu2 %v2750_v5  ;;  %804 = vmatpush.msra.mxu3 %v2751_v6 }
 0x191   :  { %745 = vmatpush.msra.mxu0 %v2752_v7  ;;  %765 = vmatpush.msra.mxu1 %v2753_v8 }
 0x192   :  { %785 = vmatpush.msra.mxu2 %v2754_v9  ;;  %805 = vmatpush.msra.mxu3 %v2755_v10 }
 0x193   :  { %746 = vmatpush.msra.mxu0 %v2756_v11  ;;  %766 = vmatpush.msra.mxu1 %v2757_v12 }
 0x194   :  { %786 = vmatpush.msra.mxu2 %v2758_v13  ;;  %806 = vmatpush.msra.mxu3 %v2759_v14 }
 0x195   :  { %747 = vmatpush.msra.mxu0 %v2760_v15  ;;  %767 = vmatpush.msra.mxu1 %v2761_v16 }
 0x196   :  { %787 = vmatpush.msra.mxu2 %v2762_v17  ;;  %807 = vmatpush.msra.mxu3 %v2763_v18 }
 0x197   :  { %748 = vmatpush.msra.mxu0 %v2764_v19  ;;  %768 = vmatpush.msra.mxu1 %v2765_v20 }
 0x198   :  { %788 = vmatpush.msra.mxu2 %v2766_v21  ;;  %808 = vmatpush.msra.mxu3 %v2767_v22  ;;  %v2174_v21 = vld [vmem:[#allocation4 + $0x1e8] sm:$0xff]  ;;  %v2177_v22 = vld [vmem:[#allocation4 + $0x1f0] sm:$0xff] }
 0x199   :  { %749 = vmatpush.msra.mxu0 %v2768_v23  ;;  %769 = vmatpush.msra.mxu1 %v2769_v24  ;;  %v2180_v23 = vld [vmem:[#allocation4 + $0x1f8] sm:$0xff]  ;;  %v2183_v24 = vld [vmem:[#allocation4 + $0x1c0] sm:$0xff] }
 0x19a   :  { %789 = vmatpush.msra.mxu2 %v2770_v25  ;;  %809 = vmatpush.msra.mxu3 %v2771_v26  ;;  %v2186_v25 = vld [vmem:[#allocation4 + $0x1c8] sm:$0xff]  ;;  %v2189_v26 = vld [vmem:[#allocation4 + $0x1d0] sm:$0xff] }
 0x1f6   :  { %v435_v29 = vpop.f32.mrf.mxu0  ;;  %v455_v30 = vpop.f32.mrf.mxu1 }
 0x1f7   :  { %v498_v31 = vadd.f32 %v1375_v27, %v435_v29  ;;  %v499_v32 = vadd.f32 %v1376_v28, %v455_v30  ;;  %v2192_v27 = vld [vmem:[#allocation4 + $0x1d8] sm:$0xff]  ;;  %v2195_v28 = vld [vmem:[#allocation4 + $0x1a0] sm:$0xff]  ;;  %v2198_v29 = vld [vmem:[#allocation4 + $0x1a8] sm:$0xff] }
 0x1f8   :  { %v2201_v30 = vld [vmem:[#allocation4 + $0x1b0] sm:$0xff] }
 0x1f9   :  { %v1379_v33 = vmul.f32 -1.442695, %v498_v31  ;;  %v1380_v35 = vmul.f32 -1.442695, %v499_v32  ;;  %v2204_v31 = vld [vmem:[#allocation4 + $0x1b8] sm:$0xff]  ;;  %v2207_v32 = vld [vmem:[#allocation4 + $0x180] sm:$0xff] }
 0x1fb   :  { %1459 = vpow2.f32 %v1379_v33  ;;  %v2210_v33 = vld [vmem:[#allocation4 + $0x188] sm:$0xff] }
 0x1fc   :  { %1461 = vpow2.f32 %v1380_v35  ;;  %v2213_v35 = vld [vmem:[#allocation4 + $0x190] sm:$0xff] }
 0x1fd   :  { %v495_v43 = vpop.f32.mrf.mxu3  ;;  %v475_v56 = vpop.f32.mrf.mxu2 }
 0x1fe   :  { %v501_v47 = vadd.f32 %v1378_v39, %v495_v43  ;;  %v500_v62 = vadd.f32 %v1377_v40, %v475_v56  ;;  %v2216_v39 = vld [vmem:[#allocation4 + $0x198] sm:$0xff]  ;;  %v2219_v43 = vld [vmem:[#allocation4 + $0x160] sm:$0xff] }
 0x1ff   :  { %v2240_v40 = vld [vmem:[#allocation4 + $0x158] sm:$0xff]  ;;  %v2243_v56 = vld [vmem:[#allocation4 + $0x120] sm:$0xff] }
 0x200   :  { %v1381_v60 = vmul.f32 -1.442695, %v501_v47  ;;  %v2222_v47 = vld [vmem:[#allocation4 + $0x168] sm:$0xff] }
 0x201   :  { %v1460_v63 = vpop.eup %1459 }
 0x202   :  { %v1462_v34 = vpop.eup %1461  ;;  %v505_v36 = vadd.f32 1.0, %v1460_v63  ;;  %1463 = vpow2.f32 %v1381_v60  ;;  %v2225_v60 = vld [vmem:[#allocation4 + $0x170] sm:$0xff]  ;;  %v2228_v63 = vld [vmem:[#allocation4 + $0x178] sm:$0xff] }
 0x203   :  { %v524_v37 = vadd.f32 1.0, %v1462_v34  ;;  %v2231_v34 = vld [vmem:[#allocation4 + $0x140] sm:$0xff] }
 0x204   :  { %1465 = vrcp.f32 %v505_v36  ;;  %v517_v41 = vand.u32 2147483648, %v505_v36  ;;  %v515_v48 = vand.u32 2147483647, %v505_v36  ;;  %vm511_vm10 = vweird.f32 %v505_v36 }
 0x205   :  { %1467 = vrcp.f32 %v524_v37  ;;  %v536_v58 = vand.u32 2147483648, %v524_v37  ;;  %v534_v61 = vand.u32 2147483647, %v524_v37  ;;  %vm530_vm11 = vweird.f32 %v524_v37 }
 0x206   :  { %v518_v42 = vor.u32 1.1754944e-38, %v517_v41  ;;  %vm516_vm14 = vcmp.eq.f32.partialorder %v515_v48, 8.507059e+37  ;;  %v2273_v41 = vld [vmem:[#allocation4 + $0xf0] sm:$0xff]  ;;  %v2282_v48 = vld [vmem:[#allocation4 + $0xc8] sm:$0xff] }
 0x207   :  { %v537_v2 = vor.u32 1.1754944e-38, %v536_v58  ;;  %vm535_vm15 = vcmp.eq.f32.partialorder %v534_v61, 8.507059e+37  ;;  %v2276_v58 = vld [vmem:[#allocation4 + $0xf8] sm:$0xff] }
 0x208   :  { %v1464_v45 = vpop.eup %1463  ;;  %v2288_v61 = vld [vmem:[#allocation4 + $0xd8] sm:$0xff] }
 0x209   :  { %v544_v53 = vadd.f32 1.0, %v1464_v45  ;;  %v2246_v45 = vld [vmem:[#allocation4 + $0x128] sm:$0xff]  ;;  %2773 = vst [vmem:[#allocation21_spill] sm:$0xff] %v2288_v61 }
 0x20a   :  { %v1466_v46 = vpop.eup %1465 }
 0x20b   :  { %v1468_v44 = vpop.eup %1467  ;;  %v507_v57 = vmul.f32 %v1466_v46, %v505_v36  ;;  %1469 = vrcp.f32 %v544_v53  ;;  %vm512_vm8 = vweird.f32 %v1466_v46  ;;  %v556_v14 = vand.u32 2147483648, %v544_v53  ;;  %v2234_v36 = vld [vmem:[#allocation4 + $0x148] sm:$0xff] }
 0x20c   :  { %v526_v0 = vmul.f32 %v1468_v44, %v524_v37  ;;  %1471 = vtanh.f32 %v500_v62  ;;  %vm531_vm9 = vweird.f32 %v1468_v44  ;;  %vm513_vm12 = vmor %vm511_vm10, %vm512_vm8  ;;  %vm550_vm1 = vweird.f32 %v544_v53  ;;  %v2237_v37 = vld [vmem:[#allocation4 + $0x150] sm:$0xff]  ;;  %v2255_v62 = vld [vmem:[#allocation4 + $0x100] sm:$0xff] }
 0x20d   :  { %v508_v38 = vsub.f32 1.0, %v507_v57  ;;  %vm532_vm13 = vmor %vm530_vm11, %vm531_vm9  ;;  %v554_v15 = vand.u32 2147483647, %v544_v53  ;;  %v557_v17 = vor.u32 1.1754944e-38, %v556_v14  ;;  %v2261_v57 = vld [vmem:[#allocation4 + $0x110] sm:$0xff]  ;;  %v2339_v14 = vld [vmem:[#allocation4 + $0x20] sm:$0xff] }
 0x20e   :  { %v527_v55 = vsub.f32 1.0, %v526_v0  ;;  %v2264_v0 = vld [vmem:[#allocation4 + $0x118] sm:$0xff]  ;;  %2790 = vst [vmem:[#allocation20_spill] sm:$0xff] %v2339_v14 }
 0x20f   :  { %v509_v52 = vmul.f32 %v1466_v46, %v508_v38  ;;  %vm555_vm3 = vcmp.eq.f32.partialorder %v554_v15, 8.507059e+37  ;;  %v2267_v38 = vld [vmem:[#allocation4 + $0xe0] sm:$0xff]  ;;  %v2342_v15 = vld [vmem:[#allocation4 + $0x28] sm:$0xff] }
 0x210   :  { %v528_v51 = vmul.f32 %v1468_v44, %v527_v55  ;;  %v2270_v55 = vld [vmem:[#allocation4 + $0xe8] sm:$0xff]  ;;  %2791 = vst [vmem:[#allocation22_spill] sm:$0xff] %v2342_v15 }
 0x211   :  { %v1470_v59 = vpop.eup %1469  ;;  %v510_v49 = vadd.f32 %v1466_v46, %v509_v52  ;;  %v2279_v52 = vld [vmem:[#allocation4 + $0xc0] sm:$0xff] }
 0x212   :  { %v529_v54 = vadd.f32 %v1468_v44, %v528_v51  ;;  %v546_v1 = vmul.f32 %v1470_v59, %v544_v53  ;;  %v1472_v4 = vpop.eup %1471  ;;  %vm551_vm0 = vweird.f32 %v1470_v59  ;;  %v2249_v53 = vld [vmem:[#allocation4 + $0x130] sm:$0xff] }
 0x213   :  { %v514_v3 = vsel %vm513_vm12, %v1466_v46, %v510_v49  ;;  %vm552_vm2 = vmor %vm550_vm1, %vm551_vm0  ;;  %v2252_v46 = vld [vmem:[#allocation4 + $0x138] sm:$0xff]  ;;  %v2285_v51 = vld [vmem:[#allocation4 + $0xd0] sm:$0xff] }
 0x214   :  { %v519_v5 = vsel %vm516_vm14, %v518_v42, %v514_v3  ;;  %v533_v6 = vsel %vm532_vm13, %v1468_v44, %v529_v54  ;;  %v547_v7 = vsub.f32 1.0, %v546_v1  ;;  %v2258_v44 = vld [vmem:[#allocation4 + $0x108] sm:$0xff]  ;;  %2772 = vst [vmem:[#allocation7_spill] sm:$0xff] %v2285_v51  ;;  %v2297_v42 = vld [vmem:[#allocation4 + $0xb0] sm:$0xff]  ;;  %v2300_v54 = vld [vmem:[#allocation4 + $0xb8] sm:$0xff] }
 0x215   :  { %v538_v8 = vsel %vm535_vm15, %v537_v2, %v533_v6  ;;  %v561_v9 = vmul.f32 %v1472_v4, %v519_v5  ;;  %v2294_v49 = vld [vmem:[#allocation4 + $0xa8] sm:$0xff]  ;;  %2776 = vst [vmem:[#allocation10_spill] sm:$0xff] %v2297_v42  ;;  %v2303_v1 = vld [vmem:[#allocation4 + $0x80] sm:$0xff]  ;;  %v2309_v3 = vld [vmem:[#allocation4 + $0x90] sm:$0xff] }
 0x216   :  { %v560_v10 = vmul.f32 %v538_v8, %v2082_v50  ;;  %v548_v11 = vmul.f32 %v1470_v59, %v547_v7  ;;  %v2171_v50 = vld [vmem:[#allocation4 + $0x1e0] sm:$0xff]  ;;  %2775 = vst [vmem:[#allocation9_spill] sm:$0xff] %v2294_v49  ;;  %v2306_v2 = vld [vmem:[#allocation4 + $0x88] sm:$0xff]  ;;  %v2312_v4 = vld [vmem:[#allocation4 + $0x98] sm:$0xff] }
 0x217   :  { %2777 = vst [vmem:[#allocation25_spill] sm:$0xff] %v2300_v54  ;;  %v2315_v5 = vld [vmem:[#allocation4 + $0x60] sm:$0xff]  ;;  %v2318_v6 = vld [vmem:[#allocation4 + $0x68] sm:$0xff]  ;;  %v2321_v7 = vld [vmem:[#allocation4 + $0x70] sm:$0xff] }
 0x218   :  { %v2165_v12 = vadd.f32 %v561_v9, %v560_v10  ;;  %v549_v13 = vadd.f32 %v1470_v59, %v548_v11  ;;  %2778 = vst [vmem:[#allocation11_spill] sm:$0xff] %v2303_v1  ;;  %v2324_v8 = vld [vmem:[#allocation4 + $0x78] sm:$0xff]  ;;  %v2327_v9 = vld [vmem:[#allocation4 + $0x40] sm:$0xff]  ;;  %v2330_v10 = vld [vmem:[#allocation4 + $0x48] sm:$0xff] }
 0x219   :  { %2779 = vst [vmem:[#allocation12_spill] sm:$0xff] %v2306_v2  ;;  %v2333_v11 = vld [vmem:[#allocation4 + $0x50] sm:$0xff] }
 0x21a   :  { %1473 = vtanh.f32 %v2165_v12  ;;  %v553_v16 = vsel %vm552_vm2, %v1470_v59, %v549_v13  ;;  %v2291_v59 = vld [vmem:[#allocation4 + $0xa0] sm:$0xff]  ;;  %2780 = vst [vmem:[#allocation13_spill] sm:$0xff] %v2309_v3  ;;  %v2336_v13 = vld [vmem:[#allocation4 + $0x58] sm:$0xff] }
 0x21b   :  { %v558_v19 = vsel %vm555_vm3, %v557_v17, %v553_v16  ;;  %2774 = vst [vmem:[#allocation8_spill] sm:$0xff] %v2291_v59  ;;  %v2345_v16 = vld [vmem:[#allocation4 + $0x30] sm:$0xff]  ;;  %v2348_v17 = vld [vmem:[#allocation4 + $0x38] sm:$0xff] }
 0x21c   :  { %2781 = vst [vmem:[#allocation29_spill] sm:$0xff] %v2312_v4 }
 0x21d   :  { %2782 = vst [vmem:[#allocation14_spill] sm:$0xff] %v2315_v5 }
 0x21e   :  { %2783 = vst [vmem:[#allocation15_spill] sm:$0xff] %v2318_v6 }
 0x21f   :  { %2784 = vst [vmem:[#allocation16_spill] sm:$0xff] %v2321_v7 }
 0x220   :  { %v1474_v18 = vpop.eup %1473  ;;  %2785 = vst [vmem:[#allocation30_spill] sm:$0xff] %v2324_v8 }
 0x221   :  { %v564_v20 = vmul.f32 %v1474_v18, %v558_v19  ;;  %2786 = vst [vmem:[#allocation17_spill] sm:$0xff] %v2327_v9  ;;  %v2351_v18 = vld [vmem:[#allocation4] sm:$0xff]  ;;  %v2354_v19 = vld [vmem:[#allocation4 + $0x8] sm:$0xff] }
 0x222   :  { %2787 = vst [vmem:[#allocation18_spill] sm:$0xff] %v2330_v10 }
 0x223   :  { %1382 = vst [vmem:[%s2585_s2 + $0x10] sm:$0xff] %v564_v20  ;;  %592 = vmatmul.f32.vlgmr.msrb.gmra.mxu0 %v564_v20  ;;  %612 = vmatmul.f32.vlgmr.msrb.gmra.mxu1 %v564_v20 }
 0x224   :  { %632 = vmatmul.f32.vlgmr.msrb.gmra.mxu2 %v564_v20  ;;  %652 = vmatmul.f32.vlgmr.msrb.gmra.mxu3 %v564_v20  ;;  %2788 = vst [vmem:[#allocation19_spill] sm:$0xff] %v2333_v11  ;;  %v2357_v20 = vld [vmem:[#allocation4 + $0x10] sm:$0xff] }
 0x225   :  { %892 = vmatpush.msrb.mxu0 %v2171_v50  ;;  %912 = vmatpush.msrb.mxu1 %v2174_v21  ;;  %2789 = vst [vmem:[#allocation31_spill] sm:$0xff] %v2336_v13 }
 0x226   :  { %932 = vmatpush.msrb.mxu2 %v2177_v22  ;;  %952 = vmatpush.msrb.mxu3 %v2180_v23  ;;  %2792 = vst [vmem:[#allocation23_spill] sm:$0xff] %v2345_v16 }
 0x227   :  { %893 = vmatpush.msrb.mxu0 %v2183_v24  ;;  %913 = vmatpush.msrb.mxu1 %v2186_v25  ;;  %2793 = vst [vmem:[#allocation32_spill] sm:$0xff] %v2348_v17 }
 0x228   :  { %933 = vmatpush.msrb.mxu2 %v2189_v26  ;;  %953 = vmatpush.msrb.mxu3 %v2192_v27  ;;  %2794 = vst [vmem:[#allocation24_spill] sm:$0xff] %v2351_v18 }
 0x229   :  { %894 = vmatpush.msrb.mxu0 %v2195_v28  ;;  %914 = vmatpush.msrb.mxu1 %v2198_v29  ;;  %2795 = vst [vmem:[#allocation26_spill] sm:$0xff] %v2354_v19 }
 0x22a   :  { %934 = vmatpush.msrb.mxu2 %v2201_v30  ;;  %954 = vmatpush.msrb.mxu3 %v2204_v31  ;;  %2796 = vst [vmem:[#allocation27_spill] sm:$0xff] %v2357_v20 }
 0x22b   :  { %895 = vmatpush.msrb.mxu0 %v2207_v32  ;;  %915 = vmatpush.msrb.mxu1 %v2210_v33 }
 0x22c   :  { %935 = vmatpush.msrb.mxu2 %v2213_v35  ;;  %955 = vmatpush.msrb.mxu3 %v2216_v39 }
 0x22d   :  { %896 = vmatpush.msrb.mxu0 %v2219_v43  ;;  %916 = vmatpush.msrb.mxu1 %v2222_v47 }
 0x22e   :  { %936 = vmatpush.msrb.mxu2 %v2225_v60  ;;  %956 = vmatpush.msrb.mxu3 %v2228_v63 }
 0x22f   :  { %897 = vmatpush.msrb.mxu0 %v2231_v34  ;;  %917 = vmatpush.msrb.mxu1 %v2234_v36 }
 0x230   :  { %937 = vmatpush.msrb.mxu2 %v2237_v37  ;;  %957 = vmatpush.msrb.mxu3 %v2240_v40 }
 0x231   :  { %898 = vmatpush.msrb.mxu0 %v2243_v56  ;;  %918 = vmatpush.msrb.mxu1 %v2246_v45 }
 0x232   :  { %938 = vmatpush.msrb.mxu2 %v2249_v53  ;;  %958 = vmatpush.msrb.mxu3 %v2252_v46 }
 0x233   :  { %899 = vmatpush.msrb.mxu0 %v2255_v62  ;;  %919 = vmatpush.msrb.mxu1 %v2258_v44 }
 0x234   :  { %939 = vmatpush.msrb.mxu2 %v2261_v57  ;;  %959 = vmatpush.msrb.mxu3 %v2264_v0 }
 0x235   :  { %900 = vmatpush.msrb.mxu0 %v2267_v38  ;;  %920 = vmatpush.msrb.mxu1 %v2270_v55 }
 0x236   :  { %940 = vmatpush.msrb.mxu2 %v2273_v41  ;;  %960 = vmatpush.msrb.mxu3 %v2276_v58 }
 0x237   :  { %901 = vmatpush.msrb.mxu0 %v2279_v52  ;;  %921 = vmatpush.msrb.mxu1 %v2282_v48 }
 0x238   :  { %941 = vmatpush.msrb.mxu2 %v2285_v51  ;;  %961 = vmatpush.msrb.mxu3 %v2288_v61 }
 0x239   :  { %902 = vmatpush.msrb.mxu0 %v2291_v59  ;;  %922 = vmatpush.msrb.mxu1 %v2294_v49 }
 0x23a   :  { %942 = vmatpush.msrb.mxu2 %v2297_v42  ;;  %962 = vmatpush.msrb.mxu3 %v2300_v54 }
 0x23b   :  { %903 = vmatpush.msrb.mxu0 %v2303_v1  ;;  %923 = vmatpush.msrb.mxu1 %v2306_v2 }
 0x23c   :  { %943 = vmatpush.msrb.mxu2 %v2309_v3  ;;  %963 = vmatpush.msrb.mxu3 %v2312_v4 }
 0x23d   :  { %904 = vmatpush.msrb.mxu0 %v2315_v5  ;;  %924 = vmatpush.msrb.mxu1 %v2318_v6 }
 0x23e   :  { %944 = vmatpush.msrb.mxu2 %v2321_v7  ;;  %964 = vmatpush.msrb.mxu3 %v2324_v8 }
 0x23f   :  { %905 = vmatpush.msrb.mxu0 %v2327_v9  ;;  %925 = vmatpush.msrb.mxu1 %v2330_v10 }
 0x240   :  { %945 = vmatpush.msrb.mxu2 %v2333_v11  ;;  %965 = vmatpush.msrb.mxu3 %v2336_v13 }
 0x241   :  { %906 = vmatpush.msrb.mxu0 %v2339_v14  ;;  %926 = vmatpush.msrb.mxu1 %v2342_v15  ;;  %v2360_v15 = vld [vmem:[#allocation4 + $0x18] sm:$0xff] }
 0x242   :  { %946 = vmatpush.msrb.mxu2 %v2345_v16  ;;  %966 = vmatpush.msrb.mxu3 %v2348_v17  ;;  %2797 = vst [vmem:[#allocation33_spill] sm:$0xff] %v2360_v15  ;;  %v1383_v17 = vld [vmem:[%s2583_s0 + $0x60] sm:$0xff] }
 0x243   :  { %907 = vmatpush.msrb.mxu0 %v2351_v18  ;;  %927 = vmatpush.msrb.mxu1 %v2354_v19  ;;  %v1384_v18 = vld [vmem:[%s2583_s0 + $0x68] sm:$0xff] }
 0x244   :  { %947 = vmatpush.msrb.mxu2 %v2357_v20  ;;  %967 = vmatpush.msrb.mxu3 %v2360_v15  ;;  %v1386_v20 = vld [vmem:[%s2583_s0 + $0x78] sm:$0xff] }
 0x2a0   :  { %v593_v16 = vpop.f32.mrf.mxu0  ;;  %v613_v14 = vpop.f32.mrf.mxu1 }
 0x2a1   :  { %v656_v13 = vadd.f32 %v1383_v17, %v593_v16  ;;  %v657_v19 = vadd.f32 %v1384_v18, %v613_v14 }
 0x2a3   :  { %v1387_v11 = vmul.f32 -1.442695, %v656_v13  ;;  %v1388_v10 = vmul.f32 -1.442695, %v657_v19  ;;  %v1385_v13 = vld [vmem:[%s2583_s0 + $0x70] sm:$0xff] }
 0x2a5   :  { %1475 = vpow2.f32 %v1387_v11 }
 0x2a6   :  { %1477 = vpow2.f32 %v1388_v10 }
 0x2a7   :  { %v653_v15 = vpop.f32.mrf.mxu3  ;;  %v633_v11 = vpop.f32.mrf.mxu2 }
 0x2a8   :  { %v659_v9 = vadd.f32 %v1386_v20, %v653_v15  ;;  %v658_v18 = vadd.f32 %v1385_v13, %v633_v11 }
 0x2aa   :  { %v1389_v8 = vmul.f32 -1.442695, %v659_v9 }
 0x2ab   :  { %v1476_v7 = vpop.eup %1475 }
 0x2ac   :  { %v1478_v6 = vpop.eup %1477  ;;  %v663_v5 = vadd.f32 1.0, %v1476_v7  ;;  %1479 = vpow2.f32 %v1389_v8 }
 0x2ad   :  { %v682_v4 = vadd.f32 1.0, %v1478_v6 }
 0x2ae   :  { %1481 = vrcp.f32 %v663_v5  ;;  %v675_v7 = vand.u32 2147483648, %v663_v5  ;;  %v673_v3 = vand.u32 2147483647, %v663_v5  ;;  %vm669_vm6 = vweird.f32 %v663_v5 }
 0x2af   :  { %1483 = vrcp.f32 %v682_v4  ;;  %v694_v6 = vand.u32 2147483648, %v682_v4  ;;  %v692_v1 = vand.u32 2147483647, %v682_v4  ;;  %vm688_vm7 = vweird.f32 %v682_v4 }
 0x2b0   :  { %v676_v13 = vor.u32 1.1754944e-38, %v675_v7  ;;  %vm674_vm10 = vcmp.eq.f32.partialorder %v673_v3, 8.507059e+37 }
 0x2b1   :  { %vm693_vm11 = vcmp.eq.f32.partialorder %v692_v1, 8.507059e+37 }
 0x2b2   :  { %v1480_v14 = vpop.eup %1479 }
 0x2b3   :  { %v702_v16 = vadd.f32 1.0, %v1480_v14 }
 0x2b4   :  { %v1482_v17 = vpop.eup %1481 }
 0x2b5   :  { %v1484_v10 = vpop.eup %1483  ;;  %v665_v19 = vmul.f32 %v1482_v17, %v663_v5  ;;  %1485 = vrcp.f32 %v702_v16  ;;  %vm670_vm4 = vweird.f32 %v1482_v17  ;;  %vm708_vm13 = vweird.f32 %v702_v16 }
 0x2b6   :  { %v684_v9 = vmul.f32 %v1484_v10, %v682_v4  ;;  %1487 = vtanh.f32 %v658_v18  ;;  %vm689_vm5 = vweird.f32 %v1484_v10  ;;  %vm671_vm8 = vmor %vm669_vm6, %vm670_vm4 }
 0x2b7   :  { %v666_v15 = vsub.f32 1.0, %v665_v19  ;;  %vm690_vm9 = vmor %vm688_vm7, %vm689_vm5  ;;  %v695_v19 = vor.u32 1.1754944e-38, %v694_v6  ;;  %v2805_v6 = vld [vmem:[#allocation12_spill] sm:$0xff] }
 0x2b8   :  { %v685_v20 = vsub.f32 1.0, %v684_v9 }
 0x2b9   :  { %v667_v8 = vmul.f32 %v1482_v17, %v666_v15 }
 0x2ba   :  { %v686_v2 = vmul.f32 %v1484_v10, %v685_v20 }
 0x2bb   :  { %v1486_v54 = vpop.eup %1485  ;;  %v668_v42 = vadd.f32 %v1482_v17, %v667_v8 }
 0x2bc   :  { %v687_v11 = vadd.f32 %v1484_v10, %v686_v2  ;;  %v704_v14 = vmul.f32 %v1486_v54, %v702_v16  ;;  %v1488_v18 = vpop.eup %1487  ;;  %vm709_vm12 = vweird.f32 %v1486_v54  ;;  %v714_v2 = vand.u32 2147483648, %v702_v16 }
 0x2bd   :  { %v672_v9 = vsel %vm671_vm8, %v1482_v17, %v668_v42  ;;  %v712_v42 = vand.u32 2147483647, %v702_v16  ;;  %vm710_vm14 = vmor %vm708_vm13, %vm709_vm12  ;;  %v2804_v16 = vld [vmem:[#allocation11_spill] sm:$0xff] }
 0x2be   :  { %v677_v49 = vsel %vm674_vm10, %v676_v13, %v672_v9  ;;  %v691_v15 = vsel %vm690_vm9, %v1484_v10, %v687_v11  ;;  %v705_v59 = vsub.f32 1.0, %v704_v14  ;;  %v715_v17 = vor.u32 1.1754944e-38, %v714_v2  ;;  %v2806_v13 = vld [vmem:[#allocation13_spill] sm:$0xff]  ;;  %v2808_v14 = vld [vmem:[#allocation14_spill] sm:$0xff]  ;;  %v2810_v9 = vld [vmem:[#allocation16_spill] sm:$0xff] }
 0x2bf   :  { %v696_v20 = vsel %vm693_vm11, %v695_v19, %v691_v15  ;;  %v719_v61 = vmul.f32 %v1488_v18, %v677_v49  ;;  %vm713_vm15 = vcmp.eq.f32.partialorder %v712_v42, 8.507059e+37  ;;  %v2802_v49 = vld [vmem:[#allocation10_spill] sm:$0xff]  ;;  %v2807_v11 = vld [vmem:[#allocation29_spill] sm:$0xff]  ;;  %v2809_v19 = vld [vmem:[#allocation15_spill] sm:$0xff] }
 0x2c0   :  { %v718_v51 = vmul.f32 %v696_v20, %v2165_v12  ;;  %v706_v8 = vmul.f32 %v1486_v54, %v705_v59  ;;  %v2798_v12 = vld [vmem:[#allocation7_spill] sm:$0xff]  ;;  %v2801_v59 = vld [vmem:[#allocation9_spill] sm:$0xff]  ;;  %v2811_v18 = vld [vmem:[#allocation30_spill] sm:$0xff] }
 0x2c1   :  { %v2812_v15 = vld [vmem:[#allocation17_spill] sm:$0xff]  ;;  %v2813_v20 = vld [vmem:[#allocation18_spill] sm:$0xff]  ;;  %v2816_v2 = vld [vmem:[#allocation20_spill] sm:$0xff] }
 0x2c2   :  { %v2376_v5 = vadd.f32 %v719_v61, %v718_v51  ;;  %v707_v4 = vadd.f32 %v1486_v54, %v706_v8  ;;  %v2799_v51 = vld [vmem:[#allocation21_spill] sm:$0xff]  ;;  %v2800_v61 = vld [vmem:[#allocation8_spill] sm:$0xff]  ;;  %v2814_v8 = vld [vmem:[#allocation19_spill] sm:$0xff] }
 0x2c3   :  { %v2817_v42 = vld [vmem:[#allocation22_spill] sm:$0xff] }
 0x2c4   :  { %1489 = vtanh.f32 %v2376_v5  ;;  %v711_v3 = vsel %vm710_vm14, %v1486_v54, %v707_v4  ;;  %v2803_v54 = vld [vmem:[#allocation25_spill] sm:$0xff]  ;;  %v2815_v4 = vld [vmem:[#allocation31_spill] sm:$0xff] }
 0x2c5   :  { %v716_v10 = vsel %vm713_vm15, %v715_v17, %v711_v3  ;;  %v2818_v3 = vld [vmem:[#allocation23_spill] sm:$0xff]  ;;  %v2819_v17 = vld [vmem:[#allocation32_spill] sm:$0xff] }
 0x2ca   :  { %v1490_v1 = vpop.eup %1489 }
 0x2cb   :  { %v722_v7 = vmul.f32 %v1490_v1, %v716_v10  ;;  %v2820_v1 = vld [vmem:[#allocation24_spill] sm:$0xff]  ;;  %v2821_v10 = vld [vmem:[#allocation26_spill] sm:$0xff] }
 0x2cd   :  { %1390 = vst [vmem:[%s2585_s2 + $0x18] sm:$0xff] %v722_v7  ;;  %750 = vmatmul.f32.vlgmr.msra.gmra.mxu0 %v722_v7  ;;  %770 = vmatmul.f32.vlgmr.msra.gmra.mxu1 %v722_v7 }
 0x2ce   :  { %790 = vmatmul.f32.vlgmr.msra.gmra.mxu2 %v722_v7  ;;  %810 = vmatmul.f32.vlgmr.msra.gmra.mxu3 %v722_v7  ;;  %v2822_v7 = vld [vmem:[#allocation27_spill] sm:$0xff] }
 0x2cf   :  { %1050 = vmatpush.msra.mxu0 %v2171_v50  ;;  %1070 = vmatpush.msra.mxu1 %v2174_v21 }
 0x2d0   :  { %1090 = vmatpush.msra.mxu2 %v2177_v22  ;;  %1110 = vmatpush.msra.mxu3 %v2180_v23 }
 0x2d1   :  { %1051 = vmatpush.msra.mxu0 %v2183_v24  ;;  %1071 = vmatpush.msra.mxu1 %v2186_v25 }
 0x2d2   :  { %1091 = vmatpush.msra.mxu2 %v2189_v26  ;;  %1111 = vmatpush.msra.mxu3 %v2192_v27 }
 0x2d3   :  { %1052 = vmatpush.msra.mxu0 %v2195_v28  ;;  %1072 = vmatpush.msra.mxu1 %v2198_v29 }
 0x2d4   :  { %1092 = vmatpush.msra.mxu2 %v2201_v30  ;;  %1112 = vmatpush.msra.mxu3 %v2204_v31 }
 0x2d5   :  { %1053 = vmatpush.msra.mxu0 %v2207_v32  ;;  %1073 = vmatpush.msra.mxu1 %v2210_v33 }
 0x2d6   :  { %1093 = vmatpush.msra.mxu2 %v2213_v35  ;;  %1113 = vmatpush.msra.mxu3 %v2216_v39 }
 0x2d7   :  { %1054 = vmatpush.msra.mxu0 %v2219_v43  ;;  %1074 = vmatpush.msra.mxu1 %v2222_v47 }
 0x2d8   :  { %1094 = vmatpush.msra.mxu2 %v2225_v60  ;;  %1114 = vmatpush.msra.mxu3 %v2228_v63 }
 0x2d9   :  { %1055 = vmatpush.msra.mxu0 %v2231_v34  ;;  %1075 = vmatpush.msra.mxu1 %v2234_v36 }
 0x2da   :  { %1095 = vmatpush.msra.mxu2 %v2237_v37  ;;  %1115 = vmatpush.msra.mxu3 %v2240_v40 }
 0x2db   :  { %1056 = vmatpush.msra.mxu0 %v2243_v56  ;;  %1076 = vmatpush.msra.mxu1 %v2246_v45 }
 0x2dc   :  { %1096 = vmatpush.msra.mxu2 %v2249_v53  ;;  %1116 = vmatpush.msra.mxu3 %v2252_v46 }
 0x2dd   :  { %1057 = vmatpush.msra.mxu0 %v2255_v62  ;;  %1077 = vmatpush.msra.mxu1 %v2258_v44 }
 0x2de   :  { %1097 = vmatpush.msra.mxu2 %v2261_v57  ;;  %1117 = vmatpush.msra.mxu3 %v2264_v0 }
 0x2df   :  { %1058 = vmatpush.msra.mxu0 %v2267_v38  ;;  %1078 = vmatpush.msra.mxu1 %v2270_v55 }
 0x2e0   :  { %1098 = vmatpush.msra.mxu2 %v2273_v41  ;;  %1118 = vmatpush.msra.mxu3 %v2276_v58 }
 0x2e1   :  { %1059 = vmatpush.msra.mxu0 %v2279_v52  ;;  %1079 = vmatpush.msra.mxu1 %v2282_v48 }
 0x2e2   :  { %1099 = vmatpush.msra.mxu2 %v2798_v12  ;;  %1119 = vmatpush.msra.mxu3 %v2799_v51 }
 0x2e3   :  { %1060 = vmatpush.msra.mxu0 %v2800_v61  ;;  %1080 = vmatpush.msra.mxu1 %v2801_v59 }
 0x2e4   :  { %1100 = vmatpush.msra.mxu2 %v2802_v49  ;;  %1120 = vmatpush.msra.mxu3 %v2803_v54 }
 0x2e5   :  { %1061 = vmatpush.msra.mxu0 %v2804_v16  ;;  %1081 = vmatpush.msra.mxu1 %v2805_v6 }
 0x2e6   :  { %1101 = vmatpush.msra.mxu2 %v2806_v13  ;;  %1121 = vmatpush.msra.mxu3 %v2807_v11 }
 0x2e7   :  { %1062 = vmatpush.msra.mxu0 %v2808_v14  ;;  %1082 = vmatpush.msra.mxu1 %v2809_v19 }
 0x2e8   :  { %1102 = vmatpush.msra.mxu2 %v2810_v9  ;;  %1122 = vmatpush.msra.mxu3 %v2811_v18 }
 0x2e9   :  { %1063 = vmatpush.msra.mxu0 %v2812_v15  ;;  %1083 = vmatpush.msra.mxu1 %v2813_v20  ;;  %v2823_v15 = vld [vmem:[#allocation33_spill] sm:$0xff] }
 0x2ea   :  { %1103 = vmatpush.msra.mxu2 %v2814_v8  ;;  %1123 = vmatpush.msra.mxu3 %v2815_v4  ;;  %v1391_v4 = vld [vmem:[%s2583_s0 + $0x80] sm:$0xff] }
 0x2eb   :  { %1064 = vmatpush.msra.mxu0 %v2816_v2  ;;  %1084 = vmatpush.msra.mxu1 %v2817_v42  ;;  %v1392_v42 = vld [vmem:[%s2583_s0 + $0x88] sm:$0xff] }
 0x2ec   :  { %1104 = vmatpush.msra.mxu2 %v2818_v3  ;;  %1124 = vmatpush.msra.mxu3 %v2819_v17 }
 0x2ed   :  { %1065 = vmatpush.msra.mxu0 %v2820_v1  ;;  %1085 = vmatpush.msra.mxu1 %v2821_v10 }
 0x2ee   :  { %1105 = vmatpush.msra.mxu2 %v2822_v7  ;;  %1125 = vmatpush.msra.mxu3 %v2823_v15  ;;  %v1394_v7 = vld [vmem:[%s2583_s0 + $0x98] sm:$0xff] }
 0x34a   :  { %v751_v2 = vpop.f32.mrf.mxu0  ;;  %v771_v3 = vpop.f32.mrf.mxu1 }
 0x34b   :  { %v814_v8 = vadd.f32 %v1391_v4, %v751_v2  ;;  %v815_v17 = vadd.f32 %v1392_v42, %v771_v3 }
 0x34d   :  { %v1395_v20 = vmul.f32 -1.442695, %v814_v8  ;;  %v1396_v1 = vmul.f32 -1.442695, %v815_v17  ;;  %v1393_v8 = vld [vmem:[%s2583_s0 + $0x90] sm:$0xff] }
 0x34f   :  { %1491 = vpow2.f32 %v1395_v20 }
 0x350   :  { %1493 = vpow2.f32 %v1396_v1 }
 0x351   :  { %v811_v15 = vpop.f32.mrf.mxu3  ;;  %v791_v20 = vpop.f32.mrf.mxu2 }
 0x352   :  { %v817_v10 = vadd.f32 %v1394_v7, %v811_v15  ;;  %v816_v3 = vadd.f32 %v1393_v8, %v791_v20 }
 0x354   :  { %v1397_v18 = vmul.f32 -1.442695, %v817_v10 }
 0x355   :  { %v1492_v9 = vpop.eup %1491 }
 0x356   :  { %v1494_v19 = vpop.eup %1493  ;;  %v821_v14 = vadd.f32 1.0, %v1492_v9  ;;  %1495 = vpow2.f32 %v1397_v18 }
 0x357   :  { %v840_v11 = vadd.f32 1.0, %v1494_v19 }
 0x358   :  { %1497 = vrcp.f32 %v821_v14  ;;  %v833_v9 = vand.u32 2147483648, %v821_v14  ;;  %v831_v13 = vand.u32 2147483647, %v821_v14  ;;  %vm827_vm2 = vweird.f32 %v821_v14 }
 0x359   :  { %1499 = vrcp.f32 %v840_v11  ;;  %v852_v19 = vand.u32 2147483648, %v840_v11  ;;  %v850_v16 = vand.u32 2147483647, %v840_v11  ;;  %vm846_vm3 = vweird.f32 %v840_v11 }
 0x35a   :  { %v834_v8 = vor.u32 1.1754944e-38, %v833_v9  ;;  %vm832_vm6 = vcmp.eq.f32.partialorder %v831_v13, 8.507059e+37 }
 0x35b   :  { %vm851_vm7 = vcmp.eq.f32.partialorder %v850_v16, 8.507059e+37 }
 0x35c   :  { %v1496_v4 = vpop.eup %1495 }
 0x35d   :  { %v860_v2 = vadd.f32 1.0, %v1496_v4 }
 0x35e   :  { %v1498_v42 = vpop.eup %1497 }
 0x35f   :  { %v1500_v17 = vpop.eup %1499  ;;  %v823_v1 = vmul.f32 %v1498_v42, %v821_v14  ;;  %1501 = vrcp.f32 %v860_v2  ;;  %vm828_vm0 = vweird.f32 %v1498_v42  ;;  %vm866_vm9 = vweird.f32 %v860_v2 }
 0x360   :  { %v842_v15 = vmul.f32 %v1500_v17, %v840_v11  ;;  %1503 = vtanh.f32 %v816_v3  ;;  %vm847_vm1 = vweird.f32 %v1500_v17  ;;  %vm829_vm4 = vmor %vm827_vm2, %vm828_vm0 }
 0x361   :  { %v824_v10 = vsub.f32 1.0, %v823_v1  ;;  %vm848_vm5 = vmor %vm846_vm3, %vm847_vm1  ;;  %v853_v1 = vor.u32 1.1754944e-38, %v852_v19 }
 0x362   :  { %v843_v7 = vsub.f32 1.0, %v842_v15 }
 0x363   :  { %v825_v18 = vmul.f32 %v1498_v42, %v824_v10 }
 0x364   :  { %v844_v6 = vmul.f32 %v1500_v17, %v843_v7 }
 0x365   :  { %v1502_v54 = vpop.eup %1501  ;;  %v826_v49 = vadd.f32 %v1498_v42, %v825_v18 }
 0x366   :  { %v845_v20 = vadd.f32 %v1500_v17, %v844_v6  ;;  %v862_v4 = vmul.f32 %v1502_v54, %v860_v2  ;;  %v1504_v3 = vpop.eup %1503  ;;  %vm867_vm8 = vweird.f32 %v1502_v54  ;;  %v872_v6 = vand.u32 2147483648, %v860_v2 }
 0x367   :  { %v830_v15 = vsel %vm829_vm4, %v1498_v42, %v826_v49  ;;  %v870_v49 = vand.u32 2147483647, %v860_v2  ;;  %vm868_vm10 = vmor %vm866_vm9, %vm867_vm8 }
 0x368   :  { %v835_v59 = vsel %vm832_vm6, %v834_v8, %v830_v15  ;;  %v849_v10 = vsel %vm848_vm5, %v1500_v17, %v845_v20  ;;  %v863_v61 = vsub.f32 1.0, %v862_v4  ;;  %v873_v42 = vor.u32 1.1754944e-38, %v872_v6 }
 0x369   :  { %v854_v7 = vsel %vm851_vm7, %v853_v1, %v849_v10  ;;  %v877_v51 = vmul.f32 %v1504_v3, %v835_v59  ;;  %vm871_vm11 = vcmp.eq.f32.partialorder %v870_v49, 8.507059e+37  ;;  %v1401_v59 = vld [vmem:[%s2583_s0 + $0xb0] sm:$0xff] }
 0x36a   :  { %v876_v12 = vmul.f32 %v854_v7, %v2376_v5  ;;  %v864_v18 = vmul.f32 %v1502_v54, %v863_v61 }
 0x36c   :  { %v2459_v14 = vadd.f32 %v877_v51, %v876_v12  ;;  %v865_v11 = vadd.f32 %v1502_v54, %v864_v18 }
 0x36e   :  { %1505 = vtanh.f32 %v2459_v14  ;;  %v869_v13 = vsel %vm868_vm10, %v1502_v54, %v865_v11 }
 0x36f   :  { %v874_v17 = vsel %vm871_vm11, %v873_v42, %v869_v13 }
 0x374   :  { %v1506_v16 = vpop.eup %1505 }
 0x375   :  { %v880_v9 = vmul.f32 %v1506_v16, %v874_v17 }
 0x377   :  { %1398 = vst [vmem:[%s2585_s2 + $0x20] sm:$0xff] %v880_v9  ;;  %908 = vmatmul.f32.vlgmr.msrb.gmra.mxu0 %v880_v9  ;;  %928 = vmatmul.f32.vlgmr.msrb.gmra.mxu1 %v880_v9 }
 0x378   :  { %948 = vmatmul.f32.vlgmr.msrb.gmra.mxu2 %v880_v9  ;;  %968 = vmatmul.f32.vlgmr.msrb.gmra.mxu3 %v880_v9 }
 0x379   :  { %1208 = vmatpush.msrb.mxu0 %v2171_v50  ;;  %1228 = vmatpush.msrb.mxu1 %v2174_v21  ;;  %v2824_v50 = vld [vmem:[#allocation7_spill] sm:$0xff]  ;;  %v2825_v21 = vld [vmem:[#allocation21_spill] sm:$0xff] }
 0x37a   :  { %1248 = vmatpush.msrb.mxu2 %v2177_v22  ;;  %1268 = vmatpush.msrb.mxu3 %v2180_v23  ;;  %v2826_v22 = vld [vmem:[#allocation8_spill] sm:$0xff]  ;;  %v2827_v23 = vld [vmem:[#allocation9_spill] sm:$0xff] }
 0x37b   :  { %1209 = vmatpush.msrb.mxu0 %v2183_v24  ;;  %1229 = vmatpush.msrb.mxu1 %v2186_v25  ;;  %v2828_v24 = vld [vmem:[#allocation10_spill] sm:$0xff]  ;;  %v2829_v25 = vld [vmem:[#allocation25_spill] sm:$0xff] }
 0x37c   :  { %1249 = vmatpush.msrb.mxu2 %v2189_v26  ;;  %1269 = vmatpush.msrb.mxu3 %v2192_v27  ;;  %v2830_v26 = vld [vmem:[#allocation11_spill] sm:$0xff]  ;;  %v2831_v27 = vld [vmem:[#allocation12_spill] sm:$0xff] }
 0x37d   :  { %1210 = vmatpush.msrb.mxu0 %v2195_v28  ;;  %1230 = vmatpush.msrb.mxu1 %v2198_v29  ;;  %v2832_v28 = vld [vmem:[#allocation13_spill] sm:$0xff] }
 0x37e   :  { %1250 = vmatpush.msrb.mxu2 %v2201_v30  ;;  %1270 = vmatpush.msrb.mxu3 %v2204_v31  ;;  %v2833_v29 = vld [vmem:[#allocation29_spill] sm:$0xff]  ;;  %v2834_v30 = vld [vmem:[#allocation14_spill] sm:$0xff]  ;;  %v2835_v31 = vld [vmem:[#allocation15_spill] sm:$0xff] }
 0x37f   :  { %1211 = vmatpush.msrb.mxu0 %v2207_v32  ;;  %1231 = vmatpush.msrb.mxu1 %v2210_v33  ;;  %v2836_v32 = vld [vmem:[#allocation16_spill] sm:$0xff]  ;;  %v2837_v33 = vld [vmem:[#allocation30_spill] sm:$0xff] }
 0x380   :  { %1251 = vmatpush.msrb.mxu2 %v2213_v35  ;;  %1271 = vmatpush.msrb.mxu3 %v2216_v39  ;;  %v2838_v35 = vld [vmem:[#allocation17_spill] sm:$0xff]  ;;  %v2839_v39 = vld [vmem:[#allocation18_spill] sm:$0xff] }
 0x381   :  { %1212 = vmatpush.msrb.mxu0 %v2219_v43  ;;  %1232 = vmatpush.msrb.mxu1 %v2222_v47  ;;  %v2840_v43 = vld [vmem:[#allocation19_spill] sm:$0xff] }
 0x382   :  { %1252 = vmatpush.msrb.mxu2 %v2225_v60  ;;  %1272 = vmatpush.msrb.mxu3 %v2228_v63  ;;  %v2841_v47 = vld [vmem:[#allocation31_spill] sm:$0xff]  ;;  %v2842_v60 = vld [vmem:[#allocation20_spill] sm:$0xff]  ;;  %v2843_v63 = vld [vmem:[#allocation22_spill] sm:$0xff] }
 0x383   :  { %1213 = vmatpush.msrb.mxu0 %v2231_v34  ;;  %1233 = vmatpush.msrb.mxu1 %v2234_v36  ;;  %v2844_v34 = vld [vmem:[#allocation23_spill] sm:$0xff]  ;;  %v2845_v36 = vld [vmem:[#allocation32_spill] sm:$0xff] }
 0x384   :  { %1253 = vmatpush.msrb.mxu2 %v2237_v37  ;;  %1273 = vmatpush.msrb.mxu3 %v2240_v40  ;;  %v2846_v37 = vld [vmem:[#allocation24_spill] sm:$0xff]  ;;  %v2847_v40 = vld [vmem:[#allocation26_spill] sm:$0xff] }
 0x385   :  { %1214 = vmatpush.msrb.mxu0 %v2243_v56  ;;  %1234 = vmatpush.msrb.mxu1 %v2246_v45  ;;  %v2848_v56 = vld [vmem:[#allocation27_spill] sm:$0xff]  ;;  %v2849_v45 = vld [vmem:[#allocation33_spill] sm:$0xff] }
 0x386   :  { %1254 = vmatpush.msrb.mxu2 %v2249_v53  ;;  %1274 = vmatpush.msrb.mxu3 %v2252_v46  ;;  %v1399_v53 = vld [vmem:[%s2583_s0 + $0xa0] sm:$0xff]  ;;  %v1400_v46 = vld [vmem:[%s2583_s0 + $0xa8] sm:$0xff] }
 0x387   :  { %1215 = vmatpush.msrb.mxu0 %v2255_v62  ;;  %1235 = vmatpush.msrb.mxu1 %v2258_v44 }
 0x388   :  { %1255 = vmatpush.msrb.mxu2 %v2261_v57  ;;  %1275 = vmatpush.msrb.mxu3 %v2264_v0 }
 0x389   :  { %1216 = vmatpush.msrb.mxu0 %v2267_v38  ;;  %1236 = vmatpush.msrb.mxu1 %v2270_v55 }
 0x38a   :  { %1256 = vmatpush.msrb.mxu2 %v2273_v41  ;;  %1276 = vmatpush.msrb.mxu3 %v2276_v58  ;;  %v1402_v41 = vld [vmem:[%s2583_s0 + $0xb8] sm:$0xff] }
 0x38b   :  { %1217 = vmatpush.msrb.mxu0 %v2279_v52  ;;  %1237 = vmatpush.msrb.mxu1 %v2282_v48 }
 0x38c   :  { %1257 = vmatpush.msrb.mxu2 %v2824_v50  ;;  %1277 = vmatpush.msrb.mxu3 %v2825_v21 }
 0x38d   :  { %1218 = vmatpush.msrb.mxu0 %v2826_v22  ;;  %1238 = vmatpush.msrb.mxu1 %v2827_v23 }
 0x38e   :  { %1258 = vmatpush.msrb.mxu2 %v2828_v24  ;;  %1278 = vmatpush.msrb.mxu3 %v2829_v25 }
 0x38f   :  { %1219 = vmatpush.msrb.mxu0 %v2830_v26  ;;  %1239 = vmatpush.msrb.mxu1 %v2831_v27 }
 0x390   :  { %1259 = vmatpush.msrb.mxu2 %v2832_v28  ;;  %1279 = vmatpush.msrb.mxu3 %v2833_v29 }
 0x391   :  { %1220 = vmatpush.msrb.mxu0 %v2834_v30  ;;  %1240 = vmatpush.msrb.mxu1 %v2835_v31 }
 0x392   :  { %1260 = vmatpush.msrb.mxu2 %v2836_v32  ;;  %1280 = vmatpush.msrb.mxu3 %v2837_v33 }
 0x393   :  { %1221 = vmatpush.msrb.mxu0 %v2838_v35  ;;  %1241 = vmatpush.msrb.mxu1 %v2839_v39 }
 0x394   :  { %1261 = vmatpush.msrb.mxu2 %v2840_v43  ;;  %1281 = vmatpush.msrb.mxu3 %v2841_v47 }
 0x395   :  { %1222 = vmatpush.msrb.mxu0 %v2842_v60  ;;  %1242 = vmatpush.msrb.mxu1 %v2843_v63 }
 0x396   :  { %1262 = vmatpush.msrb.mxu2 %v2844_v34  ;;  %1282 = vmatpush.msrb.mxu3 %v2845_v36  ;;  %v1408_v34 = vld [vmem:[%s2583_s0 + $0xc8] sm:$0xff] }
 0x397   :  { %1223 = vmatpush.msrb.mxu0 %v2846_v37  ;;  %1243 = vmatpush.msrb.mxu1 %v2847_v40 }
 0x398   :  { %1263 = vmatpush.msrb.mxu2 %v2848_v56  ;;  %1283 = vmatpush.msrb.mxu3 %v2849_v45 }
 0x3f4   :  { %v909_v62 = vpop.f32.mrf.mxu0  ;;  %v929_v44 = vpop.f32.mrf.mxu1 }
 0x3f5   :  { %v972_v57 = vadd.f32 %v1399_v53, %v909_v62  ;;  %v973_v0 = vadd.f32 %v1400_v46, %v929_v44  ;;  %v1410_v46 = vld [vmem:[%s2583_s0 + $0xd8] sm:$0xff] }
 0x3f7   :  { %v1403_v38 = vmul.f32 -1.442695, %v972_v57  ;;  %v1404_v55 = vmul.f32 -1.442695, %v973_v0 }
 0x3f9   :  { %1507 = vpow2.f32 %v1403_v38 }
 0x3fa   :  { %1509 = vpow2.f32 %v1404_v55 }
 0x3fb   :  { %v969_v58 = vpop.f32.mrf.mxu3  ;;  %v949_v54 = vpop.f32.mrf.mxu2 }
 0x3fc   :  { %v975_v52 = vadd.f32 %v1402_v41, %v969_v58  ;;  %v974_v20 = vadd.f32 %v1401_v59, %v949_v54  ;;  %v1409_v58 = vld [vmem:[%s2583_s0 + $0xd0] sm:$0xff] }
 0x3fe   :  { %v1405_v48 = vmul.f32 -1.442695, %v975_v52 }
 0x3ff   :  { %v1508_v5 = vpop.eup %1507 }
 0x400   :  { %v1510_v12 = vpop.eup %1509  ;;  %v979_v51 = vadd.f32 1.0, %v1508_v5  ;;  %1511 = vpow2.f32 %v1405_v48 }
 0x401   :  { %v998_v61 = vadd.f32 1.0, %v1510_v12 }
 0x402   :  { %1513 = vrcp.f32 %v979_v51  ;;  %v991_v7 = vand.u32 2147483648, %v979_v51  ;;  %v989_v6 = vand.u32 2147483647, %v979_v51  ;;  %vm985_vm14 = vweird.f32 %v979_v51 }
 0x403   :  { %1515 = vrcp.f32 %v998_v61  ;;  %v1010_v18 = vand.u32 2147483648, %v998_v61  ;;  %v1008_v13 = vand.u32 2147483647, %v998_v61  ;;  %vm1004_vm15 = vweird.f32 %v998_v61 }
 0x404   :  { %v992_v17 = vor.u32 1.1754944e-38, %v991_v7  ;;  %vm990_vm2 = vcmp.eq.f32.partialorder %v989_v6, 8.507059e+37 }
 0x405   :  { %v1011_v21 = vor.u32 1.1754944e-38, %v1010_v18  ;;  %vm1009_vm3 = vcmp.eq.f32.partialorder %v1008_v13, 8.507059e+37 }
 0x406   :  { %v1512_v2 = vpop.eup %1511 }
 0x407   :  { %v1018_v19 = vadd.f32 1.0, %v1512_v2 }
 0x408   :  { %v1514_v8 = vpop.eup %1513 }
 0x409   :  { %v1516_v4 = vpop.eup %1515  ;;  %v981_v1 = vmul.f32 %v1514_v8, %v979_v51  ;;  %1517 = vrcp.f32 %v1018_v19  ;;  %vm986_vm12 = vweird.f32 %v1514_v8  ;;  %v1030_v33 = vand.u32 2147483648, %v1018_v19 }
 0x40a   :  { %v1000_v15 = vmul.f32 %v1516_v4, %v998_v61  ;;  %1519 = vtanh.f32 %v974_v20  ;;  %vm1005_vm13 = vweird.f32 %v1516_v4  ;;  %vm987_vm0 = vmor %vm985_vm14, %vm986_vm12  ;;  %vm1024_vm5 = vweird.f32 %v1018_v19 }
 0x40b   :  { %v982_v3 = vsub.f32 1.0, %v981_v1  ;;  %vm1006_vm1 = vmor %vm1004_vm15, %vm1005_vm13  ;;  %v1028_v35 = vand.u32 2147483647, %v1018_v19  ;;  %v1031_v43 = vor.u32 1.1754944e-38, %v1030_v33 }
 0x40c   :  { %v1001_v10 = vsub.f32 1.0, %v1000_v15 }
 0x40d   :  { %v983_v11 = vmul.f32 %v1514_v8, %v982_v3  ;;  %vm1029_vm7 = vcmp.eq.f32.partialorder %v1028_v35, 8.507059e+37  ;;  %v1416_v35 = vld [vmem:[%s2583_s0 + $0xe8] sm:$0xff] }
 0x40e   :  { %v1002_v49 = vmul.f32 %v1516_v4, %v1001_v10 }
 0x40f   :  { %v1518_v42 = vpop.eup %1517  ;;  %v984_v16 = vadd.f32 %v1514_v8, %v983_v11 }
 0x410   :  { %v1003_v9 = vadd.f32 %v1516_v4, %v1002_v49  ;;  %v1020_v50 = vmul.f32 %v1518_v42, %v1018_v19  ;;  %v1520_v23 = vpop.eup %1519  ;;  %vm1025_vm4 = vweird.f32 %v1518_v42 }
 0x411   :  { %v988_v22 = vsel %vm987_vm0, %v1514_v8, %v984_v16  ;;  %vm1026_vm6 = vmor %vm1024_vm5, %vm1025_vm4 }
 0x412   :  { %v993_v24 = vsel %vm990_vm2, %v992_v17, %v988_v22  ;;  %v1007_v25 = vsel %vm1006_vm1, %v1516_v4, %v1003_v9  ;;  %v1021_v26 = vsub.f32 1.0, %v1020_v50 }
 0x413   :  { %v1012_v27 = vsel %vm1009_vm3, %v1011_v21, %v1007_v25  ;;  %v1035_v28 = vmul.f32 %v1520_v23, %v993_v24 }
 0x414   :  { %v1034_v29 = vmul.f32 %v1012_v27, %v2459_v14  ;;  %v1022_v30 = vmul.f32 %v1518_v42, %v1021_v26  ;;  %v1407_v14 = vld [vmem:[%s2583_s0 + $0xc0] sm:$0xff] }
 0x416   :  { %v2542_v31 = vadd.f32 %v1035_v28, %v1034_v29  ;;  %v1023_v32 = vadd.f32 %v1518_v42, %v1022_v30 }
 0x418   :  { %1521 = vtanh.f32 %v2542_v31  ;;  %v1027_v39 = vsel %vm1026_vm6, %v1518_v42, %v1023_v32 }
 0x419   :  { %v1032_v60 = vsel %vm1029_vm7, %v1031_v43, %v1027_v39 }
 0x41e   :  { %v1522_v47 = vpop.eup %1521 }
 0x41f   :  { %v1038_v63 = vmul.f32 %v1522_v47, %v1032_v60 }
 0x421   :  { %1406 = vst [vmem:[%s2585_s2 + $0x28] sm:$0xff] %v1038_v63  ;;  %1066 = vmatmul.f32.vlgmr.msra.gmra.mxu0 %v1038_v63  ;;  %1086 = vmatmul.f32.vlgmr.msra.gmra.mxu1 %v1038_v63 }
 0x422   :  { %1106 = vmatmul.f32.vlgmr.msra.gmra.mxu2 %v1038_v63  ;;  %1126 = vmatmul.f32.vlgmr.msra.gmra.mxu3 %v1038_v63 }
 0x49e   :  { %v1067_v36 = vpop.f32.mrf.mxu0  ;;  %v1087_v37 = vpop.f32.mrf.mxu1 }
 0x49f   :  { %v1130_v40 = vadd.f32 %v1407_v14, %v1067_v36  ;;  %v1131_v56 = vadd.f32 %v1408_v34, %v1087_v37  ;;  %v1418_v34 = vld [vmem:[%s2583_s0 + $0xf8] sm:$0xff] }
 0x4a1   :  { %v1411_v45 = vmul.f32 -1.442695, %v1130_v40  ;;  %v1412_v53 = vmul.f32 -1.442695, %v1131_v56 }
 0x4a3   :  { %1523 = vpow2.f32 %v1411_v45 }
 0x4a4   :  { %1525 = vpow2.f32 %v1412_v53 }
 0x4a5   :  { %v1127_v62 = vpop.f32.mrf.mxu3  ;;  %v1107_v52 = vpop.f32.mrf.mxu2 }
 0x4a6   :  { %v1133_v44 = vadd.f32 %v1410_v46, %v1127_v62  ;;  %v1132_v51 = vadd.f32 %v1409_v58, %v1107_v52  ;;  %v1417_v62 = vld [vmem:[%s2583_s0 + $0xf0] sm:$0xff] }
 0x4a8   :  { %v1413_v57 = vmul.f32 -1.442695, %v1133_v44 }
 0x4a9   :  { %v1524_v0 = vpop.eup %1523 }
 0x4aa   :  { %v1526_v38 = vpop.eup %1525  ;;  %v1137_v55 = vadd.f32 1.0, %v1524_v0  ;;  %1527 = vpow2.f32 %v1413_v57 }
 0x4ab   :  { %v1156_v41 = vadd.f32 1.0, %v1526_v38 }
 0x4ac   :  { %1529 = vrcp.f32 %v1137_v55  ;;  %v1149_v8 = vand.u32 2147483648, %v1137_v55  ;;  %v1147_v1 = vand.u32 2147483647, %v1137_v55  ;;  %vm1143_vm10 = vweird.f32 %v1137_v55 }
 0x4ad   :  { %1531 = vrcp.f32 %v1156_v41  ;;  %v1168_v20 = vand.u32 2147483648, %v1156_v41  ;;  %v1166_v3 = vand.u32 2147483647, %v1156_v41  ;;  %vm1162_vm11 = vweird.f32 %v1156_v41 }
 0x4ae   :  { %v1150_v18 = vor.u32 1.1754944e-38, %v1149_v8  ;;  %vm1148_vm14 = vcmp.eq.f32.partialorder %v1147_v1, 8.507059e+37 }
 0x4af   :  { %v1169_v49 = vor.u32 1.1754944e-38, %v1168_v20  ;;  %vm1167_vm15 = vcmp.eq.f32.partialorder %v1166_v3, 8.507059e+37 }
 0x4b0   :  { %v1528_v48 = vpop.eup %1527 }
 0x4b1   :  { %v1176_v5 = vadd.f32 1.0, %v1528_v48 }
 0x4b2   :  { %v1530_v12 = vpop.eup %1529 }
 0x4b3   :  { %v1532_v61 = vpop.eup %1531  ;;  %v1139_v59 = vmul.f32 %v1530_v12, %v1137_v55  ;;  %1533 = vrcp.f32 %v1176_v5  ;;  %vm1144_vm8 = vweird.f32 %v1530_v12  ;;  %v1188_v26 = vand.u32 2147483648, %v1176_v5 }
 0x4b4   :  { %v1158_v54 = vmul.f32 %v1532_v61, %v1156_v41  ;;  %1535 = vtanh.f32 %v1132_v51  ;;  %vm1163_vm9 = vweird.f32 %v1532_v61  ;;  %vm1145_vm12 = vmor %vm1143_vm10, %vm1144_vm8  ;;  %vm1182_vm1 = vweird.f32 %v1176_v5 }
 0x4b5   :  { %v1140_v2 = vsub.f32 1.0, %v1139_v59  ;;  %vm1164_vm13 = vmor %vm1162_vm11, %vm1163_vm9  ;;  %v1186_v27 = vand.u32 2147483647, %v1176_v5  ;;  %v1189_v29 = vor.u32 1.1754944e-38, %v1188_v26 }
 0x4b6   :  { %v1159_v19 = vsub.f32 1.0, %v1158_v54 }
 0x4b7   :  { %v1141_v4 = vmul.f32 %v1530_v12, %v1140_v2  ;;  %vm1187_vm3 = vcmp.eq.f32.partialorder %v1186_v27, 8.507059e+37 }
 0x4b8   :  { %v1160_v15 = vmul.f32 %v1532_v61, %v1159_v19 }
 0x4b9   :  { %v1534_v10 = vpop.eup %1533  ;;  %v1142_v7 = vadd.f32 %v1530_v12, %v1141_v4 }
 0x4ba   :  { %v1161_v11 = vadd.f32 %v1532_v61, %v1160_v15  ;;  %v1178_v6 = vmul.f32 %v1534_v10, %v1176_v5  ;;  %v1536_v42 = vpop.eup %1535  ;;  %vm1183_vm0 = vweird.f32 %v1534_v10 }
 0x4bb   :  { %v1146_v13 = vsel %vm1145_vm12, %v1530_v12, %v1142_v7  ;;  %vm1184_vm2 = vmor %vm1182_vm1, %vm1183_vm0 }
 0x4bc   :  { %v1151_v16 = vsel %vm1148_vm14, %v1150_v18, %v1146_v13  ;;  %v1165_v17 = vsel %vm1164_vm13, %v1532_v61, %v1161_v11  ;;  %v1179_v9 = vsub.f32 1.0, %v1178_v6 }
 0x4bd   :  { %v1170_v50 = vsel %vm1167_vm15, %v1169_v49, %v1165_v17  ;;  %v1193_v21 = vmul.f32 %v1536_v42, %v1151_v16 }
 0x4be   :  { %v1192_v22 = vmul.f32 %v1170_v50, %v2542_v31  ;;  %v1180_v23 = vmul.f32 %v1534_v10, %v1179_v9  ;;  %v1415_v31 = vld [vmem:[%s2583_s0 + $0xe0] sm:$0xff] }
 0x4c0   :  { %v2561_v24 = vadd.f32 %v1193_v21, %v1192_v22  ;;  %v1181_v25 = vadd.f32 %v1534_v10, %v1180_v23 }
 0x4c2   :  { %1537 = vtanh.f32 %v2561_v24  ;;  %v1185_v28 = vsel %vm1184_vm2, %v1534_v10, %v1181_v25 }
 0x4c3   :  { %v1190_v32 = vsel %vm1187_vm3, %v1189_v29, %v1185_v28 }
 0x4c8   :  { %v1538_v30 = vpop.eup %1537 }
 0x4c9   :  { %v1196_v33 = vmul.f32 %v1538_v30, %v1190_v32 }
 0x4cb   :  { %1414 = vst [vmem:[%s2585_s2 + $0x30] sm:$0xff] %v1196_v33  ;;  %1224 = vmatmul.f32.vlgmr.msrb.gmra.mxu0 %v1196_v33  ;;  %1244 = vmatmul.f32.vlgmr.msrb.gmra.mxu1 %v1196_v33 }
 0x4cc   :  { %1264 = vmatmul.f32.vlgmr.msrb.gmra.mxu2 %v1196_v33  ;;  %1284 = vmatmul.f32.vlgmr.msrb.gmra.mxu3 %v1196_v33 }
 0x548   :  { %v1225_v39 = vpop.f32.mrf.mxu0  ;;  %v1245_v43 = vpop.f32.mrf.mxu1 }
 0x549   :  { %v1288_v47 = vadd.f32 %v1415_v31, %v1225_v39  ;;  %v1289_v60 = vadd.f32 %v1416_v35, %v1245_v43 }
 0x54b   :  { %v1419_v63 = vmul.f32 -1.442695, %v1288_v47  ;;  %v1420_v14 = vmul.f32 -1.442695, %v1289_v60 }
 0x54d   :  { %1539 = vpow2.f32 %v1419_v63 }
 0x54e   :  { %1541 = vpow2.f32 %v1420_v14 }
 0x54f   :  { %v1285_v36 = vpop.f32.mrf.mxu3  ;;  %v1265_v44 = vpop.f32.mrf.mxu2 }
 0x550   :  { %v1291_v37 = vadd.f32 %v1418_v34, %v1285_v36  ;;  %v1290_v55 = vadd.f32 %v1417_v62, %v1265_v44 }
 0x552   :  { %v1421_v40 = vmul.f32 -1.442695, %v1291_v37 }
 0x553   :  { %v1540_v56 = vpop.eup %1539 }
 0x554   :  { %v1542_v45 = vpop.eup %1541  ;;  %v1295_v53 = vadd.f32 1.0, %v1540_v56  ;;  %1543 = vpow2.f32 %v1421_v40 }
 0x555   :  { %v1314_v46 = vadd.f32 1.0, %v1542_v45 }
 0x556   :  { %1545 = vrcp.f32 %v1295_v53  ;;  %v1307_v12 = vand.u32 2147483648, %v1295_v53  ;;  %v1305_v59 = vand.u32 2147483647, %v1295_v53  ;;  %vm1301_vm6 = vweird.f32 %v1295_v53 }
 0x557   :  { %1547 = vrcp.f32 %v1314_v46  ;;  %v1326_v51 = vand.u32 2147483648, %v1314_v46  ;;  %v1324_v2 = vand.u32 2147483647, %v1314_v46  ;;  %vm1320_vm7 = vweird.f32 %v1314_v46 }
 0x558   :  { %v1308_v20 = vor.u32 1.1754944e-38, %v1307_v12  ;;  %vm1306_vm10 = vcmp.eq.f32.partialorder %v1305_v59, 8.507059e+37 }
 0x559   :  { %v1327_v15 = vor.u32 1.1754944e-38, %v1326_v51  ;;  %vm1325_vm11 = vcmp.eq.f32.partialorder %v1324_v2, 8.507059e+37 }
 0x55a   :  { %v1544_v57 = vpop.eup %1543 }
 0x55b   :  { %v1334_v0 = vadd.f32 1.0, %v1544_v57 }
 0x55c   :  { %v1546_v38 = vpop.eup %1545 }
 0x55d   :  { %v1548_v41 = vpop.eup %1547  ;;  %v1297_v58 = vmul.f32 %v1546_v38, %v1295_v53  ;;  %1549 = vrcp.f32 %v1334_v0  ;;  %vm1302_vm4 = vweird.f32 %v1546_v38  ;;  %v1346_v9 = vand.u32 2147483648, %v1334_v0 }
 0x55e   :  { %v1316_v52 = vmul.f32 %v1548_v41, %v1314_v46  ;;  %1551 = vtanh.f32 %v1290_v55  ;;  %vm1321_vm5 = vweird.f32 %v1548_v41  ;;  %vm1303_vm8 = vmor %vm1301_vm6, %vm1302_vm4  ;;  %vm1340_vm13 = vweird.f32 %v1334_v0 }
 0x55f   :  { %v1298_v48 = vsub.f32 1.0, %v1297_v58  ;;  %vm1322_vm9 = vmor %vm1320_vm7, %vm1321_vm5  ;;  %v1344_v50 = vand.u32 2147483647, %v1334_v0  ;;  %v1347_v22 = vor.u32 1.1754944e-38, %v1346_v9 }
 0x560   :  { %v1317_v5 = vsub.f32 1.0, %v1316_v52 }
 0x561   :  { %v1299_v61 = vmul.f32 %v1546_v38, %v1298_v48  ;;  %vm1345_vm15 = vcmp.eq.f32.partialorder %v1344_v50, 8.507059e+37 }
 0x562   :  { %v1318_v54 = vmul.f32 %v1548_v41, %v1317_v5 }
 0x563   :  { %v1550_v19 = vpop.eup %1549  ;;  %v1300_v8 = vadd.f32 %v1546_v38, %v1299_v61 }
 0x564   :  { %v1319_v4 = vadd.f32 %v1548_v41, %v1318_v54  ;;  %v1336_v1 = vmul.f32 %v1550_v19, %v1334_v0  ;;  %v1552_v10 = vpop.eup %1551  ;;  %vm1341_vm12 = vweird.f32 %v1550_v19 }
 0x565   :  { %v1304_v3 = vsel %vm1303_vm8, %v1546_v38, %v1300_v8  ;;  %vm1342_vm14 = vmor %vm1340_vm13, %vm1341_vm12 }
 0x566   :  { %v1309_v7 = vsel %vm1306_vm10, %v1308_v20, %v1304_v3  ;;  %v1323_v18 = vsel %vm1322_vm9, %v1548_v41, %v1319_v4  ;;  %v1337_v11 = vsub.f32 1.0, %v1336_v1 }
 0x567   :  { %v1328_v6 = vsel %vm1325_vm11, %v1327_v15, %v1323_v18  ;;  %v1351_v49 = vmul.f32 %v1552_v10, %v1309_v7 }
 0x568   :  { %v1350_v13 = vmul.f32 %v1328_v6, %v2561_v24  ;;  %v1338_v42 = vmul.f32 %v1550_v19, %v1337_v11 }
 0x56a   :  { %v1352_v16 = vadd.f32 %v1351_v49, %v1350_v13  ;;  %v1339_v17 = vadd.f32 %v1550_v19, %v1338_v42 }
 0x56c   :  { %1553 = vtanh.f32 %v1352_v16  ;;  %v1343_v21 = vsel %vm1342_vm14, %v1550_v19, %v1339_v17 }
 0x56d   :  { %v1348_v25 = vsel %vm1345_vm15, %v1347_v22, %v1343_v21 }
 0x572   :  { %v1554_v23 = vpop.eup %1553 }
 0x573   :  { %v1354_v26 = vmul.f32 %v1554_v23, %v1348_v25 }
 0x575   :  { %1422 = vst [vmem:[%s2585_s2 + $0x38] sm:$0xff] %v1354_v26 }
 0x576   :  { %1363 = vsyncpa [#allocation5], 1 }

</bundles_post_ra>
